<compile_context>
chip_gen: v7x
topology: tpu7x:2x2x1
jax: 0.10.0
libtpu: 0.0.40
codegen_flags: <defaults>
</compile_context>

<pallas_src>
import math

import jax
import jax.numpy as jnp
from jax.experimental import pallas as pl
from jax.experimental.pallas import tpu as pltpu

# ---- model sizes (small, synthetic BERT) ----
B, S, H = 2, 8, 32          # batch, seq_len, hidden_size
NUM_HEADS, HEAD_DIM = 4, 8  # H == NUM_HEADS * HEAD_DIM
FFN = 64                    # intermediate size
NUM_CLASSES = 6
OUT_PAD = 128               # lane-dense padded classifier width
VOCAB = 50
TYPE_VOCAB = 2
DR_RATE = 0.5               # dr_rate of BERTClassifier (dropout branch taken)
LN_EPS = 1e-12


def _layer_norm(x, g, b):
    # fused-stats LayerNorm: mean and E[x^2] in one pass, var = E[x^2]-mu^2
    mu = jnp.mean(x, axis=-1, keepdims=True)
    ms = jnp.mean(x * x, axis=-1, keepdims=True)
    var = jnp.maximum(ms - mu * mu, 0.0)
    return (x - mu) * jax.lax.rsqrt(var + LN_EPS) * g + b


def bert_classifier_kernel(
    valid_ref, x_ref, drop_ref,
    ln_e_g, ln_e_b,
    wqkv, bqkv, wo_h, bo,
    ln1_g, ln1_b,
    w1, b1, w2, b2,
    ln2_g, ln2_b,
    wp, bp, wc, bc,
    out_ref,
):
    f32 = jnp.float32
    bf16 = jnp.bfloat16

    # ---- gen_attention_mask: 0 where j < valid_length[i], else -1e9 ----
    pos = jax.lax.broadcasted_iota(jnp.int32, (B, S), 1)
    neg_mask = jnp.where(pos < valid_ref[...], 0.0, -1e9).astype(f32)   # (B,S)

    # ---- embedding LayerNorm (embedding gathers + sum done in wrapper) ----
    x2 = _layer_norm(x_ref[...], ln_e_g[...], ln_e_b[...])              # (B*S,H)

    # ---- multi-head self-attention ----
    # Fused QKV: single (B*S,H) x (H,3H) MXU matmul.
    xb = x2.astype(bf16)
    qkv = jnp.dot(xb, wqkv[...], preferred_element_type=f32) + bqkv[...]

    def to_heads(base):
        # (B*S, 3H) -> (NH*B, S, HD) using ONLY static 2-D slices + stack
        # (no reshape/transpose inside the kernel). Batch index = h*B + b.
        parts = []
        for h in range(NUM_HEADS):
            lo = base + h * HEAD_DIM
            for b in range(B):
                parts.append(qkv[b * S:(b + 1) * S, lo:lo + HEAD_DIM])
        return jnp.stack(parts, axis=0)

    qh = to_heads(0).astype(bf16)
    kh = to_heads(H).astype(bf16)
    vh = to_heads(2 * H).astype(bf16)

    scale = 1.0 / math.sqrt(HEAD_DIM)
    scores = jnp.einsum('bqd,bkd->bqk', qh, kh,
                        preferred_element_type=f32) * scale     # (NH*B,S,S)
    # mask per folded batch index h*B+b is just neg_mask repeated over heads
    mask_hb = jnp.concatenate([neg_mask] * NUM_HEADS, axis=0)[:, None, :]
    scores = scores + mask_hb
    # softmax without max-subtraction: scores are tightly bounded at these
    # sizes and masked entries (-1e9) underflow exp() to exactly 0.
    p = jnp.exp(scores)
    p = p * pl.reciprocal(jnp.sum(p, axis=-1, keepdims=True), approx=True)
    ctx = jnp.einsum('bqk,bkd->bqd', p.astype(bf16), vh,
                     preferred_element_type=f32)                # (NH*B,S,HD)

    # Merge heads + output projection without reshapes: rebuild per-head
    # (B*S, HD) slabs, run ONE batched einsum against head-split W_o and sum
    # across heads (== concat-heads @ W_o).
    ctx_h = jnp.stack(
        [jnp.concatenate([ctx[h * B + b] for b in range(B)], axis=0)
         for h in range(NUM_HEADS)], axis=0)                    # (NH,B*S,HD)
    attn2 = jnp.sum(
        jnp.einsum('htd,hde->hte', ctx_h.astype(bf16), wo_h[...],
                   preferred_element_type=f32),
        axis=0) + bo[...]                                       # (B*S, H)

    h1 = _layer_norm(x2 + attn2, ln1_g[...], ln1_b[...])

    # ---- feed-forward ----
    f = jnp.dot(h1.astype(bf16), w1[...], preferred_element_type=f32) + b1[...]
    # TODO(synk): torch.nn.GELU defaults to the exact erf form; the tanh
    # approximation is used here (EUP-friendly, avoids relying on erf lowering).
    f = jax.nn.gelu(f, approximate=True)
    f = jnp.dot(f.astype(bf16), w2[...], preferred_element_type=f32) + b2[...]
    h2 = _layer_norm(h1 + f, ln2_g[...], ln2_b[...])

    # ---- BERT pooler: tanh(W_p . h[:, 0] + b_p), CLS rows via static slices
    cls = jnp.concatenate([h2[b * S:b * S + 1, :] for b in range(B)], axis=0)
    pooled = jnp.tanh(
        jnp.dot(cls.astype(bf16), wp[...], preferred_element_type=f32)
        + bp[...])

    # ---- dropout: inverted-dropout keep-mask precomputed in the wrapper ----
    # TODO(synk): torch's dropout RNG stream cannot be reproduced bit-exactly.
    pooled = pooled * drop_ref[...]

    # ---- classifier: lane-dense (B, 128) store; wrapper slices to 6 ----
    out_ref[...] = jnp.dot(pooled.astype(bf16), wc[...],
                           preferred_element_type=f32) + bc[...]


def init_params(key):
    def dense(k, shape):
        return 0.02 * jax.random.normal(k, shape, jnp.float32)
    ks = jax.random.split(key, 12)
    return dict(
        word_emb=dense(ks[0], (VOCAB, H)),
        pos_emb=dense(ks[1], (S, H)),
        type_emb=dense(ks[2], (TYPE_VOCAB, H)),
        ln_e_g=jnp.ones((1, H), jnp.float32), ln_e_b=jnp.zeros((1, H), jnp.float32),
        wq=dense(ks[3], (H, H)), bq=jnp.zeros((1, H), jnp.float32),
        wk=dense(ks[4], (H, H)), bk=jnp.zeros((1, H), jnp.float32),
        wv=dense(ks[5], (H, H)), bv=jnp.zeros((1, H), jnp.float32),
        wo=dense(ks[6], (H, H)), bo=jnp.zeros((1, H), jnp.float32),
        ln1_g=jnp.ones((1, H), jnp.float32), ln1_b=jnp.zeros((1, H), jnp.float32),
        w1=dense(ks[7], (H, FFN)), b1=jnp.zeros((1, FFN), jnp.float32),
        w2=dense(ks[8], (FFN, H)), b2=jnp.zeros((1, H), jnp.float32),
        ln2_g=jnp.ones((1, H), jnp.float32), ln2_b=jnp.zeros((1, H), jnp.float32),
        wp=dense(ks[9], (H, H)), bp=jnp.zeros((1, H), jnp.float32),
        wc=dense(ks[10], (H, NUM_CLASSES)), bc=jnp.zeros((1, NUM_CLASSES), jnp.float32),
    )


def _prep_weights(p):
    """Fuse QKV, head-split W_o, pad classifier to 128 lanes, bf16 MXU weights."""
    bf16 = jnp.bfloat16
    wqkv = jnp.concatenate([p['wq'], p['wk'], p['wv']], axis=1).astype(bf16)
    bqkv = jnp.concatenate([p['bq'], p['bk'], p['bv']], axis=1)
    wo_h = p['wo'].reshape(NUM_HEADS, HEAD_DIM, H).astype(bf16)
    wc = jnp.pad(p['wc'], ((0, 0), (0, OUT_PAD - NUM_CLASSES))).astype(bf16)
    bc = jnp.pad(p['bc'], ((0, 0), (0, OUT_PAD - NUM_CLASSES)))
    return [
        p['ln_e_g'], p['ln_e_b'],
        wqkv, bqkv, wo_h, p['bo'],
        p['ln1_g'], p['ln1_b'],
        p['w1'].astype(bf16), p['b1'],
        p['w2'].astype(bf16), p['b2'],
        p['ln2_g'], p['ln2_b'],
        p['wp'].astype(bf16), p['bp'],
        wc, bc,
    ]


@jax.jit
def bert_classifier_forward(token_ids, valid_length, segment_ids, params,
                            dropout_key):
    # glue: embedding-table gathers + flatten; everything else in the kernel
    x_emb = (params['word_emb'][token_ids]
             + params['pos_emb'][None, :, :]
             + params['type_emb'][segment_ids]).astype(jnp.float32)
    x2d = x_emb.reshape(B * S, H)                       # 2-D activation
    valid2 = valid_length.astype(jnp.int32).reshape(B, 1)

    # training-mode inverted dropout mask (p = DR_RATE), scaled by 1/(1-p)
    keep = jax.random.bernoulli(dropout_key, 1.0 - DR_RATE, (B, H))
    drop_mask = keep.astype(jnp.float32) * (1.0 / (1.0 - DR_RATE))

    weights = _prep_weights(params)
    vmem = pl.BlockSpec(memory_space=pltpu.MemorySpace.VMEM)

    out = pl.pallas_call(
        bert_classifier_kernel,
        out_shape=jax.ShapeDtypeStruct((B, OUT_PAD), jnp.float32),
        in_specs=[vmem] * (3 + len(weights)),
        out_specs=vmem,
    )(valid2, x2d, drop_mask, *weights)
    return out[:, :NUM_CLASSES]                         # (B, num_classes)


if __name__ == "__main__":
    key = jax.random.PRNGKey(0)
    pkey, tkey, skey, dkey = jax.random.split(key, 4)
    params = init_params(pkey)

    token_ids = jax.random.randint(tkey, (B, S), 0, VOCAB, dtype=jnp.int32)
    segment_ids = jax.random.randint(skey, (B, S), 0, TYPE_VOCAB,
                                     dtype=jnp.int32)
    valid_length = jnp.array([5, 8], dtype=jnp.int32)

    logits = bert_classifier_forward(token_ids, valid_length, segment_ids,
                                     params, dkey)
    jax.block_until_ready(logits)
    assert logits.shape == (B, NUM_CLASSES) and logits.dtype == jnp.float32
    assert bool(jnp.all(jnp.isfinite(logits)))
    print("KERNEL_OK")
</pallas_src>

<mosaic_0001>
module attributes {stable_mosaic.version = 11 : i64} {
  func.func @bert_classifier_kernel(%arg0: memref<2x1xi32, #tpu.memory_space<vmem>>, %arg1: memref<16x32xf32, #tpu.memory_space<vmem>>, %arg2: memref<2x32xf32, #tpu.memory_space<vmem>>, %arg3: memref<1x32xf32, #tpu.memory_space<vmem>>, %arg4: memref<1x32xf32, #tpu.memory_space<vmem>>, %arg5: memref<32x96xbf16, #tpu.memory_space<vmem>>, %arg6: memref<1x96xf32, #tpu.memory_space<vmem>>, %arg7: memref<4x8x32xbf16, #tpu.memory_space<vmem>>, %arg8: memref<1x32xf32, #tpu.memory_space<vmem>>, %arg9: memref<1x32xf32, #tpu.memory_space<vmem>>, %arg10: memref<1x32xf32, #tpu.memory_space<vmem>>, %arg11: memref<32x64xbf16, #tpu.memory_space<vmem>>, %arg12: memref<1x64xf32, #tpu.memory_space<vmem>>, %arg13: memref<64x32xbf16, #tpu.memory_space<vmem>>, %arg14: memref<1x32xf32, #tpu.memory_space<vmem>>, %arg15: memref<1x32xf32, #tpu.memory_space<vmem>>, %arg16: memref<1x32xf32, #tpu.memory_space<vmem>>, %arg17: memref<32x32xbf16, #tpu.memory_space<vmem>>, %arg18: memref<1x32xf32, #tpu.memory_space<vmem>>, %arg19: memref<32x128xbf16, #tpu.memory_space<vmem>>, %arg20: memref<1x128xf32, #tpu.memory_space<vmem>>, %arg21: memref<2x128xf32, #tpu.memory_space<vmem>>) attributes {dimension_semantics = [], scalar_prefetch = 0 : i64, scratch_operands = 0 : i64, tpu.core_type = #tpu.core_type<tc>} {
    %0 = tpu.iota {dimensions = array<i32: 1>} : vector<2x8xi32>
    %c0 = arith.constant 0 : index
    %c0_0 = arith.constant 0 : index
    %1 = vector.load %arg0[%c0, %c0_0] : memref<2x1xi32, #tpu.memory_space<vmem>>, vector<2x1xi32>
    %2 = vector.broadcast %1 : vector<2x1xi32> to vector<2x8xi32>
    %3 = arith.cmpi slt, %0, %2 : vector<2x8xi32>
    %cst = arith.constant 0.000000e+00 : f32
    %cst_1 = arith.constant -1.000000e+09 : f32
    %4 = vector.broadcast %cst : f32 to vector<2x8xf32>
    %5 = vector.broadcast %cst_1 : f32 to vector<2x8xf32>
    %6 = arith.select %3, %4, %5 : vector<2x8xi1>, vector<2x8xf32>
    %c0_2 = arith.constant 0 : index
    %c0_3 = arith.constant 0 : index
    %7 = vector.load %arg1[%c0_2, %c0_3] : memref<16x32xf32, #tpu.memory_space<vmem>>, vector<16x32xf32>
    %c0_4 = arith.constant 0 : index
    %c0_5 = arith.constant 0 : index
    %8 = vector.load %arg3[%c0_4, %c0_5] : memref<1x32xf32, #tpu.memory_space<vmem>>, vector<1x32xf32>
    %c0_6 = arith.constant 0 : index
    %c0_7 = arith.constant 0 : index
    %9 = vector.load %arg4[%c0_6, %c0_7] : memref<1x32xf32, #tpu.memory_space<vmem>>, vector<1x32xf32>
    %cst_8 = arith.constant dense<0.000000e+00> : vector<16xf32>
    %10 = vector.multi_reduction <add>, %7, %cst_8 [1] : vector<16x32xf32> to vector<16xf32>
    %11 = vector.shape_cast %10 : vector<16xf32> to vector<16x1xf32>
    %cst_9 = arith.constant 3.200000e+01 : f32
    %12 = vector.broadcast %cst_9 : f32 to vector<16x1xf32>
    %13 = arith.divf %11, %12 : vector<16x1xf32>
    %14 = arith.mulf %7, %7 : vector<16x32xf32>
    %cst_10 = arith.constant dense<0.000000e+00> : vector<16xf32>
    %15 = vector.multi_reduction <add>, %14, %cst_10 [1] : vector<16x32xf32> to vector<16xf32>
    %16 = vector.shape_cast %15 : vector<16xf32> to vector<16x1xf32>
    %cst_11 = arith.constant 3.200000e+01 : f32
    %17 = vector.broadcast %cst_11 : f32 to vector<16x1xf32>
    %18 = arith.divf %16, %17 : vector<16x1xf32>
    %19 = arith.mulf %13, %13 : vector<16x1xf32>
    %20 = arith.subf %18, %19 : vector<16x1xf32>
    %cst_12 = arith.constant 0.000000e+00 : f32
    %21 = vector.broadcast %cst_12 : f32 to vector<16x1xf32>
    %22 = arith.maximumf %20, %21 : vector<16x1xf32>
    %23 = vector.broadcast %13 : vector<16x1xf32> to vector<16x32xf32>
    %24 = arith.subf %7, %23 : vector<16x32xf32>
    %cst_13 = arith.constant 9.99999996E-13 : f32
    %25 = vector.broadcast %cst_13 : f32 to vector<16x1xf32>
    %26 = arith.addf %22, %25 : vector<16x1xf32>
    %27 = math.rsqrt %26 : vector<16x1xf32>
    %28 = vector.broadcast %27 : vector<16x1xf32> to vector<16x32xf32>
    %29 = arith.mulf %24, %28 : vector<16x32xf32>
    %30 = vector.broadcast %8 : vector<1x32xf32> to vector<16x32xf32>
    %31 = arith.mulf %29, %30 : vector<16x32xf32>
    %32 = vector.broadcast %9 : vector<1x32xf32> to vector<16x32xf32>
    %33 = arith.addf %31, %32 : vector<16x32xf32>
    %34 = arith.truncf %33 : vector<16x32xf32> to vector<16x32xbf16>
    %c0_14 = arith.constant 0 : index
    %c0_15 = arith.constant 0 : index
    %35 = vector.load %arg5[%c0_14, %c0_15] : memref<32x96xbf16, #tpu.memory_space<vmem>>, vector<32x96xbf16>
    %cst_16 = arith.constant dense<0.000000e+00> : vector<16x96xf32>
    %36 = tpu.matmul %34, %35, %cst_16 {dimension_numbers = #tpu.dot_dimension_numbers<[1], [0], [0], [1], [0, 0, 1, 1], [], []>} : vector<16x32xbf16>, vector<32x96xbf16>, vector<16x96xf32> -> vector<16x96xf32>
    %c0_17 = arith.constant 0 : index
    %c0_18 = arith.constant 0 : index
    %37 = vector.load %arg6[%c0_17, %c0_18] : memref<1x96xf32, #tpu.memory_space<vmem>>, vector<1x96xf32>
    %38 = vector.broadcast %37 : vector<1x96xf32> to vector<16x96xf32>
    %39 = arith.addf %36, %38 : vector<16x96xf32>
    %40 = vector.extract_strided_slice %39 {offsets = [0, 0], sizes = [8, 8], strides = [1, 1]} : vector<16x96xf32> to vector<8x8xf32>
    %41 = vector.extract_strided_slice %39 {offsets = [8, 0], sizes = [8, 8], strides = [1, 1]} : vector<16x96xf32> to vector<8x8xf32>
    %42 = vector.extract_strided_slice %39 {offsets = [0, 8], sizes = [8, 8], strides = [1, 1]} : vector<16x96xf32> to vector<8x8xf32>
    %43 = vector.extract_strided_slice %39 {offsets = [8, 8], sizes = [8, 8], strides = [1, 1]} : vector<16x96xf32> to vector<8x8xf32>
    %44 = vector.extract_strided_slice %39 {offsets = [0, 16], sizes = [8, 8], strides = [1, 1]} : vector<16x96xf32> to vector<8x8xf32>
    %45 = vector.extract_strided_slice %39 {offsets = [8, 16], sizes = [8, 8], strides = [1, 1]} : vector<16x96xf32> to vector<8x8xf32>
    %46 = vector.extract_strided_slice %39 {offsets = [0, 24], sizes = [8, 8], strides = [1, 1]} : vector<16x96xf32> to vector<8x8xf32>
    %47 = vector.extract_strided_slice %39 {offsets = [8, 24], sizes = [8, 8], strides = [1, 1]} : vector<16x96xf32> to vector<8x8xf32>
    %48 = vector.shape_cast %40 : vector<8x8xf32> to vector<1x8x8xf32>
    %49 = vector.shape_cast %41 : vector<8x8xf32> to vector<1x8x8xf32>
    %50 = vector.shape_cast %42 : vector<8x8xf32> to vector<1x8x8xf32>
    %51 = vector.shape_cast %43 : vector<8x8xf32> to vector<1x8x8xf32>
    %52 = vector.shape_cast %44 : vector<8x8xf32> to vector<1x8x8xf32>
    %53 = vector.shape_cast %45 : vector<8x8xf32> to vector<1x8x8xf32>
    %54 = vector.shape_cast %46 : vector<8x8xf32> to vector<1x8x8xf32>
    %55 = vector.shape_cast %47 : vector<8x8xf32> to vector<1x8x8xf32>
    %56 = tpu.concatenate %48, %49, %50, %51, %52, %53, %54, %55 in 0 : vector<1x8x8xf32>, vector<1x8x8xf32>, vector<1x8x8xf32>, vector<1x8x8xf32>, vector<1x8x8xf32>, vector<1x8x8xf32>, vector<1x8x8xf32>, vector<1x8x8xf32> -> vector<8x8x8xf32>
    %57 = arith.truncf %56 : vector<8x8x8xf32> to vector<8x8x8xbf16>
    %58 = vector.extract_strided_slice %39 {offsets = [0, 32], sizes = [8, 8], strides = [1, 1]} : vector<16x96xf32> to vector<8x8xf32>
    %59 = vector.extract_strided_slice %39 {offsets = [8, 32], sizes = [8, 8], strides = [1, 1]} : vector<16x96xf32> to vector<8x8xf32>
    %60 = vector.extract_strided_slice %39 {offsets = [0, 40], sizes = [8, 8], strides = [1, 1]} : vector<16x96xf32> to vector<8x8xf32>
    %61 = vector.extract_strided_slice %39 {offsets = [8, 40], sizes = [8, 8], strides = [1, 1]} : vector<16x96xf32> to vector<8x8xf32>
    %62 = vector.extract_strided_slice %39 {offsets = [0, 48], sizes = [8, 8], strides = [1, 1]} : vector<16x96xf32> to vector<8x8xf32>
    %63 = vector.extract_strided_slice %39 {offsets = [8, 48], sizes = [8, 8], strides = [1, 1]} : vector<16x96xf32> to vector<8x8xf32>
    %64 = vector.extract_strided_slice %39 {offsets = [0, 56], sizes = [8, 8], strides = [1, 1]} : vector<16x96xf32> to vector<8x8xf32>
    %65 = vector.extract_strided_slice %39 {offsets = [8, 56], sizes = [8, 8], strides = [1, 1]} : vector<16x96xf32> to vector<8x8xf32>
    %66 = vector.shape_cast %58 : vector<8x8xf32> to vector<1x8x8xf32>
    %67 = vector.shape_cast %59 : vector<8x8xf32> to vector<1x8x8xf32>
    %68 = vector.shape_cast %60 : vector<8x8xf32> to vector<1x8x8xf32>
    %69 = vector.shape_cast %61 : vector<8x8xf32> to vector<1x8x8xf32>
    %70 = vector.shape_cast %62 : vector<8x8xf32> to vector<1x8x8xf32>
    %71 = vector.shape_cast %63 : vector<8x8xf32> to vector<1x8x8xf32>
    %72 = vector.shape_cast %64 : vector<8x8xf32> to vector<1x8x8xf32>
    %73 = vector.shape_cast %65 : vector<8x8xf32> to vector<1x8x8xf32>
    %74 = tpu.concatenate %66, %67, %68, %69, %70, %71, %72, %73 in 0 : vector<1x8x8xf32>, vector<1x8x8xf32>, vector<1x8x8xf32>, vector<1x8x8xf32>, vector<1x8x8xf32>, vector<1x8x8xf32>, vector<1x8x8xf32>, vector<1x8x8xf32> -> vector<8x8x8xf32>
    %75 = arith.truncf %74 : vector<8x8x8xf32> to vector<8x8x8xbf16>
    %76 = vector.extract_strided_slice %39 {offsets = [0, 64], sizes = [8, 8], strides = [1, 1]} : vector<16x96xf32> to vector<8x8xf32>
    %77 = vector.extract_strided_slice %39 {offsets = [8, 64], sizes = [8, 8], strides = [1, 1]} : vector<16x96xf32> to vector<8x8xf32>
    %78 = vector.extract_strided_slice %39 {offsets = [0, 72], sizes = [8, 8], strides = [1, 1]} : vector<16x96xf32> to vector<8x8xf32>
    %79 = vector.extract_strided_slice %39 {offsets = [8, 72], sizes = [8, 8], strides = [1, 1]} : vector<16x96xf32> to vector<8x8xf32>
    %80 = vector.extract_strided_slice %39 {offsets = [0, 80], sizes = [8, 8], strides = [1, 1]} : vector<16x96xf32> to vector<8x8xf32>
    %81 = vector.extract_strided_slice %39 {offsets = [8, 80], sizes = [8, 8], strides = [1, 1]} : vector<16x96xf32> to vector<8x8xf32>
    %82 = vector.extract_strided_slice %39 {offsets = [0, 88], sizes = [8, 8], strides = [1, 1]} : vector<16x96xf32> to vector<8x8xf32>
    %83 = vector.extract_strided_slice %39 {offsets = [8, 88], sizes = [8, 8], strides = [1, 1]} : vector<16x96xf32> to vector<8x8xf32>
    %84 = vector.shape_cast %76 : vector<8x8xf32> to vector<1x8x8xf32>
    %85 = vector.shape_cast %77 : vector<8x8xf32> to vector<1x8x8xf32>
    %86 = vector.shape_cast %78 : vector<8x8xf32> to vector<1x8x8xf32>
    %87 = vector.shape_cast %79 : vector<8x8xf32> to vector<1x8x8xf32>
    %88 = vector.shape_cast %80 : vector<8x8xf32> to vector<1x8x8xf32>
    %89 = vector.shape_cast %81 : vector<8x8xf32> to vector<1x8x8xf32>
    %90 = vector.shape_cast %82 : vector<8x8xf32> to vector<1x8x8xf32>
    %91 = vector.shape_cast %83 : vector<8x8xf32> to vector<1x8x8xf32>
    %92 = tpu.concatenate %84, %85, %86, %87, %88, %89, %90, %91 in 0 : vector<1x8x8xf32>, vector<1x8x8xf32>, vector<1x8x8xf32>, vector<1x8x8xf32>, vector<1x8x8xf32>, vector<1x8x8xf32>, vector<1x8x8xf32>, vector<1x8x8xf32> -> vector<8x8x8xf32>
    %93 = arith.truncf %92 : vector<8x8x8xf32> to vector<8x8x8xbf16>
    "tpu.trace_start"() <{level = 10 : i32, message = "bqd,bkd->bqk"}> : () -> ()
    %cst_19 = arith.constant dense<0.000000e+00> : vector<8x8x8xf32>
    %94 = tpu.matmul %57, %75, %cst_19 {dimension_numbers = #tpu.dot_dimension_numbers<[2], [2], [1], [1], [0, 0, 0, 1, 1, 1], [0], [0]>} : vector<8x8x8xbf16>, vector<8x8x8xbf16>, vector<8x8x8xf32> -> vector<8x8x8xf32>
    "tpu.trace_stop"() : () -> ()
    %cst_20 = arith.constant 0.353553385 : f32
    %95 = vector.broadcast %cst_20 : f32 to vector<8x8x8xf32>
    %96 = arith.mulf %94, %95 : vector<8x8x8xf32>
    %97 = tpu.concatenate %6, %6, %6, %6 in 0 : vector<2x8xf32>, vector<2x8xf32>, vector<2x8xf32>, vector<2x8xf32> -> vector<8x8xf32>
    %98 = vector.shape_cast %97 : vector<8x8xf32> to vector<8x1x8xf32>
    %99 = vector.broadcast %98 : vector<8x1x8xf32> to vector<8x8x8xf32>
    %100 = arith.addf %96, %99 : vector<8x8x8xf32>
    %101 = math.exp %100 : vector<8x8x8xf32>
    %cst_21 = arith.constant dense<0.000000e+00> : vector<8x8xf32>
    %102 = vector.multi_reduction <add>, %101, %cst_21 [2] : vector<8x8x8xf32> to vector<8x8xf32>
    %103 = vector.shape_cast %102 : vector<8x8xf32> to vector<8x8x1xf32>
    %104 = tpu.reciprocal %103 {approx = true} : vector<8x8x1xf32> -> vector<8x8x1xf32>
    %105 = vector.broadcast %104 : vector<8x8x1xf32> to vector<8x8x8xf32>
    %106 = arith.mulf %101, %105 : vector<8x8x8xf32>
    %107 = arith.truncf %106 : vector<8x8x8xf32> to vector<8x8x8xbf16>
    "tpu.trace_start"() <{level = 10 : i32, message = "bqk,bkd->bqd"}> : () -> ()
    %cst_22 = arith.constant dense<0.000000e+00> : vector<8x8x8xf32>
    %108 = tpu.matmul %107, %93, %cst_22 {dimension_numbers = #tpu.dot_dimension_numbers<[2], [1], [1], [2], [0, 0, 0, 1, 1, 2], [0], [0]>} : vector<8x8x8xbf16>, vector<8x8x8xbf16>, vector<8x8x8xf32> -> vector<8x8x8xf32>
    "tpu.trace_stop"() : () -> ()
    %109 = vector.extract_strided_slice %108 {offsets = [0, 0, 0], sizes = [1, 8, 8], strides = [1, 1, 1]} : vector<8x8x8xf32> to vector<1x8x8xf32>
    %110 = vector.shape_cast %109 : vector<1x8x8xf32> to vector<8x8xf32>
    %111 = vector.extract_strided_slice %108 {offsets = [1, 0, 0], sizes = [1, 8, 8], strides = [1, 1, 1]} : vector<8x8x8xf32> to vector<1x8x8xf32>
    %112 = vector.shape_cast %111 : vector<1x8x8xf32> to vector<8x8xf32>
    %113 = tpu.concatenate %110, %112 in 0 : vector<8x8xf32>, vector<8x8xf32> -> vector<16x8xf32>
    %114 = vector.extract_strided_slice %108 {offsets = [2, 0, 0], sizes = [1, 8, 8], strides = [1, 1, 1]} : vector<8x8x8xf32> to vector<1x8x8xf32>
    %115 = vector.shape_cast %114 : vector<1x8x8xf32> to vector<8x8xf32>
    %116 = vector.extract_strided_slice %108 {offsets = [3, 0, 0], sizes = [1, 8, 8], strides = [1, 1, 1]} : vector<8x8x8xf32> to vector<1x8x8xf32>
    %117 = vector.shape_cast %116 : vector<1x8x8xf32> to vector<8x8xf32>
    %118 = tpu.concatenate %115, %117 in 0 : vector<8x8xf32>, vector<8x8xf32> -> vector<16x8xf32>
    %119 = vector.extract_strided_slice %108 {offsets = [4, 0, 0], sizes = [1, 8, 8], strides = [1, 1, 1]} : vector<8x8x8xf32> to vector<1x8x8xf32>
    %120 = vector.shape_cast %119 : vector<1x8x8xf32> to vector<8x8xf32>
    %121 = vector.extract_strided_slice %108 {offsets = [5, 0, 0], sizes = [1, 8, 8], strides = [1, 1, 1]} : vector<8x8x8xf32> to vector<1x8x8xf32>
    %122 = vector.shape_cast %121 : vector<1x8x8xf32> to vector<8x8xf32>
    %123 = tpu.concatenate %120, %122 in 0 : vector<8x8xf32>, vector<8x8xf32> -> vector<16x8xf32>
    %124 = vector.extract_strided_slice %108 {offsets = [6, 0, 0], sizes = [1, 8, 8], strides = [1, 1, 1]} : vector<8x8x8xf32> to vector<1x8x8xf32>
    %125 = vector.shape_cast %124 : vector<1x8x8xf32> to vector<8x8xf32>
    %126 = vector.extract_strided_slice %108 {offsets = [7, 0, 0], sizes = [1, 8, 8], strides = [1, 1, 1]} : vector<8x8x8xf32> to vector<1x8x8xf32>
    %127 = vector.shape_cast %126 : vector<1x8x8xf32> to vector<8x8xf32>
    %128 = tpu.concatenate %125, %127 in 0 : vector<8x8xf32>, vector<8x8xf32> -> vector<16x8xf32>
    %129 = vector.shape_cast %113 : vector<16x8xf32> to vector<1x16x8xf32>
    %130 = vector.shape_cast %118 : vector<16x8xf32> to vector<1x16x8xf32>
    %131 = vector.shape_cast %123 : vector<16x8xf32> to vector<1x16x8xf32>
    %132 = vector.shape_cast %128 : vector<16x8xf32> to vector<1x16x8xf32>
    %133 = tpu.concatenate %129, %130, %131, %132 in 0 : vector<1x16x8xf32>, vector<1x16x8xf32>, vector<1x16x8xf32>, vector<1x16x8xf32> -> vector<4x16x8xf32>
    %134 = arith.truncf %133 : vector<4x16x8xf32> to vector<4x16x8xbf16>
    %c0_23 = arith.constant 0 : index
    %c0_24 = arith.constant 0 : index
    %c0_25 = arith.constant 0 : index
    %135 = vector.load %arg7[%c0_23, %c0_24, %c0_25] : memref<4x8x32xbf16, #tpu.memory_space<vmem>>, vector<4x8x32xbf16>
    "tpu.trace_start"() <{level = 10 : i32, message = "htd,hde->hte"}> : () -> ()
    %cst_26 = arith.constant dense<0.000000e+00> : vector<4x16x32xf32>
    %136 = tpu.matmul %134, %135, %cst_26 {dimension_numbers = #tpu.dot_dimension_numbers<[2], [1], [1], [2], [0, 0, 0, 1, 1, 2], [0], [0]>} : vector<4x16x8xbf16>, vector<4x8x32xbf16>, vector<4x16x32xf32> -> vector<4x16x32xf32>
    "tpu.trace_stop"() : () -> ()
    %cst_27 = arith.constant dense<0.000000e+00> : vector<16x32xf32>
    %137 = vector.multi_reduction <add>, %136, %cst_27 [0] : vector<4x16x32xf32> to vector<16x32xf32>
    %c0_28 = arith.constant 0 : index
    %c0_29 = arith.constant 0 : index
    %138 = vector.load %arg8[%c0_28, %c0_29] : memref<1x32xf32, #tpu.memory_space<vmem>>, vector<1x32xf32>
    %139 = vector.broadcast %138 : vector<1x32xf32> to vector<16x32xf32>
    %140 = arith.addf %137, %139 : vector<16x32xf32>
    %141 = arith.addf %33, %140 : vector<16x32xf32>
    %c0_30 = arith.constant 0 : index
    %c0_31 = arith.constant 0 : index
    %142 = vector.load %arg9[%c0_30, %c0_31] : memref<1x32xf32, #tpu.memory_space<vmem>>, vector<1x32xf32>
    %c0_32 = arith.constant 0 : index
    %c0_33 = arith.constant 0 : index
    %143 = vector.load %arg10[%c0_32, %c0_33] : memref<1x32xf32, #tpu.memory_space<vmem>>, vector<1x32xf32>
    %cst_34 = arith.constant dense<0.000000e+00> : vector<16xf32>
    %144 = vector.multi_reduction <add>, %141, %cst_34 [1] : vector<16x32xf32> to vector<16xf32>
    %145 = vector.shape_cast %144 : vector<16xf32> to vector<16x1xf32>
    %cst_35 = arith.constant 3.200000e+01 : f32
    %146 = vector.broadcast %cst_35 : f32 to vector<16x1xf32>
    %147 = arith.divf %145, %146 : vector<16x1xf32>
    %148 = arith.mulf %141, %141 : vector<16x32xf32>
    %cst_36 = arith.constant dense<0.000000e+00> : vector<16xf32>
    %149 = vector.multi_reduction <add>, %148, %cst_36 [1] : vector<16x32xf32> to vector<16xf32>
    %150 = vector.shape_cast %149 : vector<16xf32> to vector<16x1xf32>
    %cst_37 = arith.constant 3.200000e+01 : f32
    %151 = vector.broadcast %cst_37 : f32 to vector<16x1xf32>
    %152 = arith.divf %150, %151 : vector<16x1xf32>
    %153 = arith.mulf %147, %147 : vector<16x1xf32>
    %154 = arith.subf %152, %153 : vector<16x1xf32>
    %cst_38 = arith.constant 0.000000e+00 : f32
    %155 = vector.broadcast %cst_38 : f32 to vector<16x1xf32>
    %156 = arith.maximumf %154, %155 : vector<16x1xf32>
    %157 = vector.broadcast %147 : vector<16x1xf32> to vector<16x32xf32>
    %158 = arith.subf %141, %157 : vector<16x32xf32>
    %cst_39 = arith.constant 9.99999996E-13 : f32
    %159 = vector.broadcast %cst_39 : f32 to vector<16x1xf32>
    %160 = arith.addf %156, %159 : vector<16x1xf32>
    %161 = math.rsqrt %160 : vector<16x1xf32>
    %162 = vector.broadcast %161 : vector<16x1xf32> to vector<16x32xf32>
    %163 = arith.mulf %158, %162 : vector<16x32xf32>
    %164 = vector.broadcast %142 : vector<1x32xf32> to vector<16x32xf32>
    %165 = arith.mulf %163, %164 : vector<16x32xf32>
    %166 = vector.broadcast %143 : vector<1x32xf32> to vector<16x32xf32>
    %167 = arith.addf %165, %166 : vector<16x32xf32>
    %168 = arith.truncf %167 : vector<16x32xf32> to vector<16x32xbf16>
    %c0_40 = arith.constant 0 : index
    %c0_41 = arith.constant 0 : index
    %169 = vector.load %arg11[%c0_40, %c0_41] : memref<32x64xbf16, #tpu.memory_space<vmem>>, vector<32x64xbf16>
    %cst_42 = arith.constant dense<0.000000e+00> : vector<16x64xf32>
    %170 = tpu.matmul %168, %169, %cst_42 {dimension_numbers = #tpu.dot_dimension_numbers<[1], [0], [0], [1], [0, 0, 1, 1], [], []>} : vector<16x32xbf16>, vector<32x64xbf16>, vector<16x64xf32> -> vector<16x64xf32>
    %c0_43 = arith.constant 0 : index
    %c0_44 = arith.constant 0 : index
    %171 = vector.load %arg12[%c0_43, %c0_44] : memref<1x64xf32, #tpu.memory_space<vmem>>, vector<1x64xf32>
    %172 = vector.broadcast %171 : vector<1x64xf32> to vector<16x64xf32>
    %173 = arith.addf %170, %172 : vector<16x64xf32>
    %174 = arith.mulf %173, %173 : vector<16x64xf32>
    %175 = arith.mulf %173, %174 : vector<16x64xf32>
    %cst_45 = arith.constant 4.471500e-02 : f32
    %176 = vector.broadcast %cst_45 : f32 to vector<16x64xf32>
    %177 = arith.mulf %176, %175 : vector<16x64xf32>
    %178 = arith.addf %173, %177 : vector<16x64xf32>
    %cst_46 = arith.constant 0.797884583 : f32
    %179 = vector.broadcast %cst_46 : f32 to vector<16x64xf32>
    %180 = arith.mulf %179, %178 : vector<16x64xf32>
    %181 = math.tanh %180 : vector<16x64xf32>
    %cst_47 = arith.constant 1.000000e+00 : f32
    %182 = vector.broadcast %cst_47 : f32 to vector<16x64xf32>
    %183 = arith.addf %182, %181 : vector<16x64xf32>
    %cst_48 = arith.constant 5.000000e-01 : f32
    %184 = vector.broadcast %cst_48 : f32 to vector<16x64xf32>
    %185 = arith.mulf %184, %183 : vector<16x64xf32>
    %186 = arith.mulf %173, %185 : vector<16x64xf32>
    %187 = arith.truncf %186 : vector<16x64xf32> to vector<16x64xbf16>
    %c0_49 = arith.constant 0 : index
    %c0_50 = arith.constant 0 : index
    %188 = vector.load %arg13[%c0_49, %c0_50] : memref<64x32xbf16, #tpu.memory_space<vmem>>, vector<64x32xbf16>
    %cst_51 = arith.constant dense<0.000000e+00> : vector<16x32xf32>
    %189 = tpu.matmul %187, %188, %cst_51 {dimension_numbers = #tpu.dot_dimension_numbers<[1], [0], [0], [1], [0, 0, 1, 1], [], []>} : vector<16x64xbf16>, vector<64x32xbf16>, vector<16x32xf32> -> vector<16x32xf32>
    %c0_52 = arith.constant 0 : index
    %c0_53 = arith.constant 0 : index
    %190 = vector.load %arg14[%c0_52, %c0_53] : memref<1x32xf32, #tpu.memory_space<vmem>>, vector<1x32xf32>
    %191 = vector.broadcast %190 : vector<1x32xf32> to vector<16x32xf32>
    %192 = arith.addf %189, %191 : vector<16x32xf32>
    %193 = arith.addf %167, %192 : vector<16x32xf32>
    %c0_54 = arith.constant 0 : index
    %c0_55 = arith.constant 0 : index
    %194 = vector.load %arg15[%c0_54, %c0_55] : memref<1x32xf32, #tpu.memory_space<vmem>>, vector<1x32xf32>
    %c0_56 = arith.constant 0 : index
    %c0_57 = arith.constant 0 : index
    %195 = vector.load %arg16[%c0_56, %c0_57] : memref<1x32xf32, #tpu.memory_space<vmem>>, vector<1x32xf32>
    %cst_58 = arith.constant dense<0.000000e+00> : vector<16xf32>
    %196 = vector.multi_reduction <add>, %193, %cst_58 [1] : vector<16x32xf32> to vector<16xf32>
    %197 = vector.shape_cast %196 : vector<16xf32> to vector<16x1xf32>
    %cst_59 = arith.constant 3.200000e+01 : f32
    %198 = vector.broadcast %cst_59 : f32 to vector<16x1xf32>
    %199 = arith.divf %197, %198 : vector<16x1xf32>
    %200 = arith.mulf %193, %193 : vector<16x32xf32>
    %cst_60 = arith.constant dense<0.000000e+00> : vector<16xf32>
    %201 = vector.multi_reduction <add>, %200, %cst_60 [1] : vector<16x32xf32> to vector<16xf32>
    %202 = vector.shape_cast %201 : vector<16xf32> to vector<16x1xf32>
    %cst_61 = arith.constant 3.200000e+01 : f32
    %203 = vector.broadcast %cst_61 : f32 to vector<16x1xf32>
    %204 = arith.divf %202, %203 : vector<16x1xf32>
    %205 = arith.mulf %199, %199 : vector<16x1xf32>
    %206 = arith.subf %204, %205 : vector<16x1xf32>
    %cst_62 = arith.constant 0.000000e+00 : f32
    %207 = vector.broadcast %cst_62 : f32 to vector<16x1xf32>
    %208 = arith.maximumf %206, %207 : vector<16x1xf32>
    %209 = vector.broadcast %199 : vector<16x1xf32> to vector<16x32xf32>
    %210 = arith.subf %193, %209 : vector<16x32xf32>
    %cst_63 = arith.constant 9.99999996E-13 : f32
    %211 = vector.broadcast %cst_63 : f32 to vector<16x1xf32>
    %212 = arith.addf %208, %211 : vector<16x1xf32>
    %213 = math.rsqrt %212 : vector<16x1xf32>
    %214 = vector.broadcast %213 : vector<16x1xf32> to vector<16x32xf32>
    %215 = arith.mulf %210, %214 : vector<16x32xf32>
    %216 = vector.broadcast %194 : vector<1x32xf32> to vector<16x32xf32>
    %217 = arith.mulf %215, %216 : vector<16x32xf32>
    %218 = vector.broadcast %195 : vector<1x32xf32> to vector<16x32xf32>
    %219 = arith.addf %217, %218 : vector<16x32xf32>
    %220 = vector.extract_strided_slice %219 {offsets = [0, 0], sizes = [1, 32], strides = [1, 1]} : vector<16x32xf32> to vector<1x32xf32>
    %221 = vector.extract_strided_slice %219 {offsets = [8, 0], sizes = [1, 32], strides = [1, 1]} : vector<16x32xf32> to vector<1x32xf32>
    %222 = tpu.concatenate %220, %221 in 0 : vector<1x32xf32>, vector<1x32xf32> -> vector<2x32xf32>
    %223 = arith.truncf %222 : vector<2x32xf32> to vector<2x32xbf16>
    %c0_64 = arith.constant 0 : index
    %c0_65 = arith.constant 0 : index
    %224 = vector.load %arg17[%c0_64, %c0_65] : memref<32x32xbf16, #tpu.memory_space<vmem>>, vector<32x32xbf16>
    %cst_66 = arith.constant dense<0.000000e+00> : vector<2x32xf32>
    %225 = tpu.matmul %223, %224, %cst_66 {dimension_numbers = #tpu.dot_dimension_numbers<[1], [0], [0], [1], [0, 0, 1, 1], [], []>} : vector<2x32xbf16>, vector<32x32xbf16>, vector<2x32xf32> -> vector<2x32xf32>
    %c0_67 = arith.constant 0 : index
    %c0_68 = arith.constant 0 : index
    %226 = vector.load %arg18[%c0_67, %c0_68] : memref<1x32xf32, #tpu.memory_space<vmem>>, vector<1x32xf32>
    %227 = vector.broadcast %226 : vector<1x32xf32> to vector<2x32xf32>
    %228 = arith.addf %225, %227 : vector<2x32xf32>
    %229 = math.tanh %228 : vector<2x32xf32>
    %c0_69 = arith.constant 0 : index
    %c0_70 = arith.constant 0 : index
    %230 = vector.load %arg2[%c0_69, %c0_70] : memref<2x32xf32, #tpu.memory_space<vmem>>, vector<2x32xf32>
    %231 = arith.mulf %229, %230 : vector<2x32xf32>
    %232 = arith.truncf %231 : vector<2x32xf32> to vector<2x32xbf16>
    %c0_71 = arith.constant 0 : index
    %c0_72 = arith.constant 0 : index
    %233 = vector.load %arg19[%c0_71, %c0_72] : memref<32x128xbf16, #tpu.memory_space<vmem>>, vector<32x128xbf16>
    %cst_73 = arith.constant dense<0.000000e+00> : vector<2x128xf32>
    %234 = tpu.matmul %232, %233, %cst_73 {dimension_numbers = #tpu.dot_dimension_numbers<[1], [0], [0], [1], [0, 0, 1, 1], [], []>} : vector<2x32xbf16>, vector<32x128xbf16>, vector<2x128xf32> -> vector<2x128xf32>
    %c0_74 = arith.constant 0 : index
    %c0_75 = arith.constant 0 : index
    %235 = vector.load %arg20[%c0_74, %c0_75] : memref<1x128xf32, #tpu.memory_space<vmem>>, vector<1x128xf32>
    %236 = vector.broadcast %235 : vector<1x128xf32> to vector<2x128xf32>
    %237 = arith.addf %234, %236 : vector<2x128xf32>
    %c0_76 = arith.constant 0 : index
    %c0_77 = arith.constant 0 : index
    %238 = vector.load %arg21[%c0_76, %c0_77] : memref<2x128xf32, #tpu.memory_space<vmem>>, vector<2x128xf32>
    tpu.vector_store %arg21[%c0_76, %c0_77], %237 {strides = array<i32>} : memref<2x128xf32, #tpu.memory_space<vmem>>, vector<2x128xf32>,
    return
  }
}

</mosaic_0001>

<bundles_post_ra>
// kernel: bert_classifier_forward.1
= control target key start
LH: loop header
LB: loop body
LE: loop exit
PB: predicated region body
PF: predicated region fallthrough
CT: control target
= control target key end

     0   :  { %s2691_s0 = inlined_call_operand.vmem [shape: s32[2,1], index: 0, kind: input, shape index: {}]   ;;  %s2692_s1 = inlined_call_operand.vmem [shape: f32[16,32], index: 1, kind: input, shape index: {}]   ;;  %s2693_s2 = inlined_call_operand.vmem [shape: f32[2,32], index: 2, kind: input, shape index: {}]   ;;  %s2694_s3 = inlined_call_operand.vmem [shape: f32[1,32], index: 3, kind: input, shape index: {}]   ;;  %s2695_s4 = inlined_call_operand.vmem [shape: f32[1,32], index: 4, kind: input, shape index: {}]   ;;  %s2696_s5 = inlined_call_operand.vmem [shape: bf16[32,96], index: 5, kind: input, shape index: {}]   ;;  %s2697_s6 = inlined_call_operand.vmem [shape: f32[1,96], index: 6, kind: input, shape index: {}]   ;;  %s2698_s7 = inlined_call_operand.vmem [shape: bf16[4,8,32], index: 7, kind: input, shape index: {}]   ;;  %s2699_s8 = inlined_call_operand.vmem [shape: f32[1,32], index: 8, kind: input, shape index: {}]   ;;  %s2700_s9 = inlined_call_operand.vmem [shape: f32[1,32], index: 9, kind: input, shape index: {}]   ;;  %s2701_s10 = inlined_call_operand.vmem [shape: f32[1,32], index: 10, kind: input, shape index: {}]   ;;  %s2702_s11 = inlined_call_operand.vmem [shape: bf16[32,64], index: 11, kind: input, shape index: {}]   ;;  %s2703_s12 = inlined_call_operand.vmem [shape: f32[1,64], index: 12, kind: input, shape index: {}]   ;;  %s2704_s13 = inlined_call_operand.vmem [shape: bf16[64,32], index: 13, kind: input, shape index: {}]   ;;  %s2705_s14 = inlined_call_operand.vmem [shape: f32[1,32], index: 14, kind: input, shape index: {}]   ;;  %s2706_s15 = inlined_call_operand.vmem [shape: f32[1,32], index: 15, kind: input, shape index: {}]   ;;  %s2707_s16 = inlined_call_operand.vmem [shape: f32[1,32], index: 16, kind: input, shape index: {}]   ;;  %s2708_s17 = inlined_call_operand.vmem [shape: bf16[32,32], index: 17, kind: input, shape index: {}]   ;;  %s2709_s18 = inlined_call_operand.vmem [shape: f32[1,32], index: 18, kind: input, shape index: {}]   ;;  %s2710_s19 = inlined_call_operand.vmem [shape: bf16[32,128], index: 19, kind: input, shape index: {}]   ;;  %s2711_s20 = inlined_call_operand.vmem [shape: f32[1,128], index: 20, kind: input, shape index: {}]   ;;  %s2712_s21 = inlined_call_operand.hbm [shape: f32[2,128], index: 21, kind: output, shape index: {}]  }
   0x1   :  { %2715 = sst [smem:[#allocation5_spill]] %s2691_s0 }
   0x2   :  { %2716 = sst [smem:[#allocation6_spill]] %s2692_s1 }
   0x3   :  { %2717 = sst [smem:[#allocation7_spill]] %s2693_s2 }
   0x4   :  { %2718 = sst [smem:[#allocation8_spill]] %s2694_s3 }
   0x5   :  { %2719 = sst [smem:[#allocation9_spill]] %s2695_s4 }
   0x6   :  { %2720 = sst [smem:[#allocation10_spill]] %s2696_s5 }
   0x7   :  { %s2721_s26 = sld [smem:[#allocation6_spill]]  ;;  %vm82_vm0 = vcmask 261120  }
   0xd   :  { %v78_v0 = vld [vmem:[%s2721_s26] sm:$0xff]  ;;  %v79_v1 = vld [vmem:[%s2721_s26 + $0x8] sm:$0xff] }
   0xe   :  { %v83_v2 = vsel %vm82_vm0, %v78_v0, 0.0  ;;  %v92_v3 = vmul.f32 %v78_v0, %v78_v0  ;;  %v86_v4 = vsel %vm82_vm0, %v79_v1, 0.0  ;;  %v93_v5 = vmul.f32 %v79_v1, %v79_v1 }
   0xf   :  { %84 = vadd.xlane.f32.xlu0 %v83_v2 }
  0x10   :  { %v94_v6 = vsel %vm82_vm0, %v92_v3, 0.0  ;;  %v97_v7 = vsel %vm82_vm0, %v93_v5, 0.0 }
  0x11   :  { %95 = vadd.xlane.f32.xlu1 %v94_v6 }
  0x13   :  { %87 = vadd.xlane.f32.xlu0 %v86_v4 }
  0x15   :  { %98 = vadd.xlane.f32.xlu1 %v97_v7 }
  0x16   :  { %26 = vsyncpa [#allocation3], 0  ;;  %s2722_s0 = sld [smem:[#allocation10_spill]]  ;;  %v2223_v9 = vmov 0.0   ;;  %vm2224_vm1 = vmmov 0   ;;  %s2723_s23 = sld [smem:[#allocation8_spill]] }
  0x17   :  { %1945 = vmatprep.subr.bf16.mxu0 %v2223_v9  ;;  %1949 = vmatprep.mubr.msk.bf16.mxu0 %vm2224_vm1, %v2223_v9  ;;  %s2724_s2 = sld [smem:[#allocation9_spill]]  ;;  %v1841_v40 = vld [vmem:[%s2697_s6] ss:$0 sm:$0xff]  ;;  %s2225_s27 = smov 112   ;;  %v2227_v48 = vmov 0   ;;  %vm231_vm2 = vcmask 64512  }
  0x18   :  { %1953 = vmatprep.subr.bf16.mxu1 %v2223_v9  ;;  %1955 = vmatprep.mubr.msk.bf16.mxu1 %vm2224_vm1, %v2223_v9  ;;  %s2226_s3 = smov 120   ;;  %s2228_s28 = smov 104   ;;  %vm638_vm3 = vcmask 1043456   ;;  %vm636_vm5 = vcmask 1041408   ;;  %vm640_vm6 = vcmask 1045504   ;;  %vm1585_vm7 = vcmask 523264  }
  0x19   :  { %2135 = vset.pattern.permute.xlu1 %v2227_v48  ;;  %2136 = vset.pattern.permute.xlu0 %v2227_v48  ;;  %s2229_s29 = smov 96   ;;  %s2725_s4 = sld [smem:[#allocation5_spill]]  ;;  %vm1685_vm8 = vcmask 1040384  }
  0x1a   :  { %s2230_s30 = smov 64   ;;  %s2726_s5 = sld [smem:[#allocation7_spill]] }
  0x1c   :  { %v2137_v8 = vld [vmem:[%s2722_s0] sm:$0xff]   ;;  %v2138_v10 = vld [vmem:[%s2722_s0 + $0x8] sm:$0xff]  }
  0x1d   :  { %1946 = vmatpush3.bf16.msra.mxu0 %v2137_v8  ;;  %v1839_v30 = vld [vmem:[%s2723_s23] ss:$0 sm:$0xff] }
  0x1e   :  { %1947 = vmatprep.subr.bf16.mxu0 %v2223_v9  ;;  %v1840_v35 = vld [vmem:[%s2724_s2] ss:$0 sm:$0xff] }
  0x1f   :  { %v72_v6 = vld [vmem:[%s2725_s4] sm:$0x3] }
  0x21   :  { %1948 = vmatpush3.bf16.msra.mxu0 %v2138_v10 }
  0x22   :  { %1959 = vmatprep.subr.bf16.mxu0 %v2223_v9 }
  0x9c   :  { %v85_v11 = vpop.xlane.xlu0 %84 }
  0x9d   :  { %v90_v12 = vmul.f32 0.03125, %v85_v11 }
  0x9e   :  { %v96_v13 = vpop.xlane.xlu1 %95 }
  0x9f   :  { %v102_v14 = vmul.f32 %v90_v12, %v90_v12  ;;  %v100_v15 = vmul.f32 0.03125, %v96_v13  ;;  %v108_v27 = vsub.f32 %v78_v0, %v90_v12 }
  0xa0   :  { %v88_v16 = vpop.xlane.xlu0 %87 }
  0xa1   :  { %v104_v17 = vsub.f32 %v100_v15, %v102_v14  ;;  %v91_v18 = vmul.f32 0.03125, %v88_v16 }
  0xa2   :  { %v99_v19 = vpop.xlane.xlu1 %98 }
  0xa3   :  { %v106_v20 = vmax.f32 %v104_v17, 0.0  ;;  %v103_v21 = vmul.f32 %v91_v18, %v91_v18  ;;  %v101_v22 = vmul.f32 0.03125, %v99_v19  ;;  %v109_v31 = vsub.f32 %v79_v1, %v91_v18 }
  0xa5   :  { %v110_v23 = vadd.f32 1e-12, %v106_v20  ;;  %v105_v24 = vsub.f32 %v101_v22, %v103_v21 }
  0xa7   :  { %2149 = vrsqrt.f32 %v110_v23  ;;  %v107_v25 = vmax.f32 %v105_v24, 0.0 }
  0xa9   :  { %v111_v26 = vadd.f32 1e-12, %v107_v25  ;;  %v70_v25 = vlaneseq }
  0xab   :  { %2151 = vrsqrt.f32 %v111_v26  ;;  %v71_v26 = vand.u32 127, %v70_v25 }
  0xb1   :  { %v2150_v28 = vpop.eup %2149 }
  0xb2   :  { %v114_v29 = vmul.f32 %v2150_v28, %v108_v27  ;;  %v2231_v27 = vmov -1e+09  }
  0xb4   :  { %v122_v34 = vmul.f32 %v1839_v30, %v114_v29 }
  0xb5   :  { %v2152_v32 = vpop.eup %2151 }
  0xb6   :  { %v115_v33 = vmul.f32 %v2152_v32, %v109_v31  ;;  %v2374_v37 = vadd.f32 %v1840_v35, %v122_v34 }
  0xb8   :  { %v123_v36 = vmul.f32 %v1839_v30, %v115_v33  ;;  %v2232_v30 = vmov 1966171168  }
  0xb9   :  { %v645_v31 = vunpack.c.l.s4 %v2232_v30 }
  0xba   :  { %v2376_v38 = vadd.f32 %v1840_v35, %v123_v36  ;;  %v648_v35 = vshrl.u32 %v70_v25, 7 }
  0xbb   :  { %v646_v34 = vunpack.c.0.s8 %v645_v31 }
  0xbc   :  { %v132_v39 = vpack.c.bf16 %v2376_v38, %v2374_v37 }
  0xbe   :  { %1950 = vmatmul.mubr.msk.bf16.vlgmr.msra.gmra.mrb[0].mxu0 %vm82_vm0, %v132_v39 }
  0xbf   :  { %1961 = vmatprep.mubr.msk.bf16.mxu0 %vm2224_vm1, %v2223_v9 }
 0x191   :  { %v193_v41 = vpop.f32.mrb[0].mxu0 }
 0x192   :  { %v1951_v42 = vpop.f32.mrb[1].mxu0  ;;  %v194_v44 = vadd.f32 %v1841_v40, %v193_v41 }
 0x193   :  { %v196_v43 = vpop.f32.mrb[2].mxu0 }
 0x194   :  { %v197_v45 = vadd.f32 %v1841_v40, %v196_v43  ;;  %v1952_v46 = vpop.f32.mrb[3].mxu0  ;;  %v220_v50 = vpack.c.bf16 %v194_v44, %v194_v44  ;;  %v649_v40 = vsub.s32 %v646_v34, %v648_v35 }
 0x196   :  { %v2125_v47 = vpack.i.bf16 %v197_v45, %v194_v44  ;;  %v221_v49 = vpack.c.bf16 %v197_v45, %v197_v45 }
 0x198   :  { %2126 = vrot.lane.b32.xlu1 %v2125_v47, %s2225_s27  ;;  %2121 = vrot.lane.b32.xlu0 %v2125_v47, %s2226_s3 }
 0x19c   :  { %2131 = vrot.lane.b32.xlu1 %v2125_v47, %s2228_s28  ;;  %279 = vrot.lane.b32.xlu0 %v221_v49, %s2229_s29  ;;  %v2462_v47 = vsub.s32 0, %v648_v35 }
 0x1a0   :  { %229 = vrot.lane.b32.xlu1 %v220_v50, %s2229_s29 }
 0x20a   :  { %v2127_v51 = vpop.permute.xlu1 %2126  ;;  %v2122_v52 = vpop.permute.xlu0 %2121 }
 0x20b   :  { %v2124_v53 = vunpack.i.h.bf16 %v2122_v52  ;;  %v2123_v54 = vunpack.i.l.bf16 %v2122_v52  ;;  %v2129_v55 = vunpack.i.h.bf16 %v2127_v51  ;;  %v2128_v56 = vunpack.i.l.bf16 %v2127_v51 }
 0x20d   :  { %v223_v57 = vpack.c.bf16 %v2124_v53, %v2124_v53  ;;  %v222_v58 = vpack.c.bf16 %v2123_v54, %v2123_v54  ;;  %v2391_v62 = vpack.c.bf16 %v2129_v55, %v2129_v55  ;;  %v2393_v63 = vpack.c.bf16 %v2128_v56, %v2128_v56 }
 0x20e   :  { %v2132_v59 = vpop.permute.xlu1 %2131  ;;  %v280_v60 = vpop.permute.xlu0 %279 }
 0x20f   :  { %v285_v61 = vsel %vm231_vm2, %v280_v60, 0  ;;  %328 = vrot.lane.b32.xlu1 %v222_v58, %s2229_s29  ;;  %377 = vrot.lane.b32.xlu0 %v223_v57, %s2229_s29  ;;  %v2134_v0 = vunpack.i.h.bf16 %v2132_v59  ;;  %v2133_v1 = vunpack.i.l.bf16 %v2132_v59 }
 0x210   :  { %1960 = vmatpush3.bf16.xpose.msra.mxu0 %v285_v61 }
 0x211   :  { %1971 = vmatprep.subr.bf16.mxu0 %v2223_v9  ;;  %v2401_v4 = vpack.c.bf16 %v2134_v0, %v2134_v0  ;;  %v2403_v5 = vpack.c.bf16 %v2133_v1, %v2133_v1 }
 0x212   :  { %v230_v2 = vpop.permute.xlu1 %229 }
 0x213   :  { %426 = vrot.lane.b32.xlu1 %v2393_v63, %s2229_s29  ;;  %475 = vrot.lane.b32.xlu0 %v2391_v62, %s2229_s29  ;;  %v236_v3 = vsel %vm231_vm2, %v230_v2, 0 }
 0x214   :  { %1954 = vmatpush3.bf16.xpose.msra.mxu1 %v236_v3 }
 0x215   :  { %1965 = vmatprep.subr.bf16.mxu1 %v2223_v9 }
 0x217   :  { %524 = vrot.lane.b32.xlu1 %v2403_v5, %s2229_s29  ;;  %573 = vrot.lane.b32.xlu0 %v2401_v4, %s2229_s29 }
 0x218   :  { %1962 = vmatmul.mubr.msk.bf16.vlgmr.msra.gmra.mrb[4].mxu0 %vm231_vm2, %v221_v49 }
 0x219   :  { %1973 = vmatprep.mubr.msk.bf16.mxu0 %vm2224_vm1, %v2223_v9 }
 0x21b   :  { %1956 = vmatmul.mubr.msk.bf16.vlgmr.msra.gmra.mrb[0].mxu1 %vm231_vm2, %v220_v50  ;;  %804 = vrot.lane.b32.xlu0 %v220_v50, %s2230_s30 }
 0x21c   :  { %74 = vperm.xlu1 %2135, %v72_v6   ;;  %1967 = vmatprep.mubr.msk.bf16.mxu1 %vm2224_vm1, %v2223_v9 }
 0x220   :  { %852 = vrot.lane.b32.xlu1 %v221_v49, %s2230_s30 }
 0x224   :  { %900 = vrot.lane.b32.xlu1 %v222_v58, %s2230_s30 }
 0x228   :  { %948 = vrot.lane.b32.xlu1 %v223_v57, %s2230_s30 }
 0x281   :  { %v329_v7 = vpop.permute.xlu1 %328  ;;  %v378_v8 = vpop.permute.xlu0 %377 }
 0x282   :  { %v334_v10 = vsel %vm231_vm2, %v329_v7, 0  ;;  %v383_v11 = vsel %vm231_vm2, %v378_v8, 0 }
 0x283   :  { %1966 = vmatpush3.bf16.xpose.msra.mxu1 %v334_v10  ;;  %1972 = vmatpush3.bf16.xpose.msra.mxu0 %v383_v11 }
 0x284   :  { %1977 = vmatprep.subr.bf16.mxu1 %v2223_v9  ;;  %1983 = vmatprep.subr.bf16.mxu0 %v2223_v9 }
 0x285   :  { %v427_v12 = vpop.permute.xlu1 %426  ;;  %v476_v13 = vpop.permute.xlu0 %475 }
 0x286   :  { %v432_v14 = vsel %vm231_vm2, %v427_v12, 0  ;;  %v481_v15 = vsel %vm231_vm2, %v476_v13, 0 }
 0x289   :  { %v525_v16 = vpop.permute.xlu1 %524  ;;  %v574_v17 = vpop.permute.xlu0 %573 }
 0x28a   :  { %1968 = vmatmul.mubr.msk.bf16.vlgmr.msra.gmra.mrb[4].mxu1 %vm231_vm2, %v222_v58  ;;  %1974 = vmatmul.mubr.msk.bf16.vlgmr.msra.gmra.mrb[8].mxu0 %vm231_vm2, %v223_v57  ;;  %v530_v18 = vsel %vm231_vm2, %v525_v16, 0  ;;  %v579_v19 = vsel %vm231_vm2, %v574_v17, 0 }
 0x28b   :  { %1978 = vmatpush3.bf16.xpose.msra.mxu1 %v432_v14  ;;  %1984 = vmatpush3.bf16.xpose.msra.mxu0 %v481_v15 }
 0x28c   :  { %1979 = vmatprep.mubr.msk.bf16.mxu1 %vm2224_vm1, %v2223_v9  ;;  %1985 = vmatprep.mubr.msk.bf16.mxu0 %vm2224_vm1, %v2223_v9 }
 0x28d   :  { %1989 = vmatprep.subr.bf16.mxu1 %v2223_v9  ;;  %1995 = vmatprep.subr.bf16.mxu0 %v2223_v9  ;;  %v805_v20 = vpop.permute.xlu0 %804 }
 0x28e   :  { %v810_v21 = vsel %vm638_vm3, %v805_v20, 0 }
 0x292   :  { %1980 = vmatmul.mubr.msk.bf16.vlgmr.msra.gmra.mrb[8].mxu1 %vm231_vm2, %v2393_v63  ;;  %1986 = vmatmul.mubr.msk.bf16.vlgmr.msra.gmra.mrb[12].mxu0 %vm231_vm2, %v2391_v62 }
 0x293   :  { %1990 = vmatpush3.bf16.xpose.msra.mxu1 %v530_v18  ;;  %1996 = vmatpush3.bf16.xpose.msra.mxu0 %v579_v19 }
 0x294   :  { %1991 = vmatprep.mubr.msk.bf16.mxu1 %vm2224_vm1, %v2223_v9  ;;  %1997 = vmatprep.mubr.msk.bf16.mxu0 %vm2224_vm1, %v2223_v9 }
 0x295   :  { %2001 = vmatprep.subr.bf16.mxu1 %v2223_v9  ;;  %2007 = vmatprep.subr.bf16.mxu0 %v2223_v9 }
 0x29a   :  { %1992 = vmatmul.mubr.msk.bf16.vlgmr.msra.gmra.mrb[12].mxu1 %vm231_vm2, %v2403_v5  ;;  %1998 = vmatmul.mubr.msk.bf16.vlgmr.msra.gmra.mrb[16].mxu0 %vm231_vm2, %v2401_v4 }
 0x29b   :  { %v75_v22 = vpop.permute.xlu1 %74  ;;  %2002 = vmatpush3.bf16.msra.mxu1 %v810_v21  ;;  %2009 = vmatprep.mubr.msk.bf16.mxu0 %vm2224_vm1, %v2223_v9 }
 0x29c   :  { %2003 = vmatprep.mubr.msk.bf16.mxu1 %vm2224_vm1, %v2223_v9  ;;  %2013 = vmatprep.subr.bf16.mxu1 %v2223_v9  ;;  %vm76_vm4 = vcmp.lt.s32.totalorder %v71_v26, %v75_v22 }
 0x29d   :  { %v77_v28 = vsel %vm76_vm4, 0.0, %v2231_v27 }
 0x29e   :  { %v630_v29 = vrot.slane %v77_v28, 6  ;;  %v632_v32 = vrot.slane %v77_v28, 4  ;;  %v634_v36 = vrot.slane %v77_v28, 2 }
 0x29f   :  { %v853_v23 = vpop.permute.xlu1 %852 }
 0x2a0   :  { %v858_v24 = vsel %vm638_vm3, %v853_v23, 0  ;;  %v637_v33 = vsel %vm636_vm5, %v77_v28, %v630_v29 }
 0x2a1   :  { %2008 = vmatpush3.bf16.msra.mxu0 %v858_v24  ;;  %v639_v39 = vsel %vm638_vm3, %v637_v33, %v632_v32 }
 0x2a2   :  { %2019 = vmatprep.subr.bf16.mxu0 %v2223_v9  ;;  %v641_v41 = vsel %vm640_vm6, %v639_v39, %v634_v36 }
 0x2a3   :  { %v650_v42 = vrot.slane %v641_v41, %v649_v40  ;;  %v643_v44 = vcombine.high %v641_v41, %v641_v41 }
 0x2a5   :  { %v658_v43 = vcombine.high %v650_v42, %v650_v42  ;;  %v666_v45 = vrot.slane %v650_v42, %v649_v40  ;;  %v657_v46 = vrot.slane %v643_v44, %v649_v40 }
 0x2a7   :  { %v680_v48 = vrot.slane %v658_v43, %v649_v40  ;;  %v688_v49 = vcombine.high %v666_v45, %v666_v45  ;;  %v673_v50 = vrot.slane %v657_v46, %v649_v40  ;;  %v659_v51 = vcombine.high %v657_v46, %v657_v46 }
 0x2a8   :  { %v695_v7 = vrot.slane %v666_v45, %v2462_v47 }
 0x2a9   :  { %v703_v52 = vrot.slane %v688_v49, %v2462_v47  ;;  %v690_v53 = vcombine.high %v680_v48, %v680_v48  ;;  %v711_v54 = vrot.slane %v673_v50, %v2462_v47  ;;  %v687_v55 = vrot.slane %v659_v51, %v649_v40 }
 0x2aa   :  { %v689_v56 = vcombine.high %v673_v50, %v673_v50  ;;  %v699_v0 = vrot.slane %v680_v48, %v2462_v47 }
 0x2ab   :  { %v707_v57 = vrot.slane %v690_v53, %v2462_v47  ;;  %v715_v58 = vrot.slane %v687_v55, %v2462_v47  ;;  %v691_v59 = vcombine.high %v687_v55, %v687_v55 }
 0x2ac   :  { %v2469_v60 = vrot.slane %v689_v56, %v2462_v47 }
 0x2ad   :  { %v2472_v61 = vrot.slane %v691_v59, %v2462_v47 }
 0x2eb   :  { %v321_v1 = vpop.f32.mrb[4].mxu0 }
 0x2ec   :  { %v622_v2 = vmul.f32 0.35355338, %v321_v1  ;;  %v1963_v3 = vpop.f32.mrb[5].mxu0 }
 0x2ed   :  { %v324_v6 = vpop.f32.mrb[6].mxu0 }
 0x2ee   :  { %v733_v8 = vadd.f32 %v699_v0, %v622_v2  ;;  %v1964_v10 = vpop.f32.mrb[7].mxu0  ;;  %v272_v11 = vpop.f32.mrb[0].mxu1 }
 0x2ef   :  { %v621_v12 = vmul.f32 0.35355338, %v272_v11  ;;  %v1957_v13 = vpop.f32.mrb[1].mxu1 }
 0x2f0   :  { %v742_v14 = vmul.f32 1.442695, %v733_v8  ;;  %v275_v15 = vpop.f32.mrb[2].mxu1 }
 0x2f1   :  { %v732_v16 = vadd.f32 %v695_v7, %v621_v12  ;;  %v1958_v17 = vpop.f32.mrb[3].mxu1 }
 0x2f2   :  { %2153 = vpow2.f32 %v742_v14 }
 0x2f3   :  { %v740_v18 = vmul.f32 1.442695, %v732_v16 }
 0x2f5   :  { %2155 = vpow2.f32 %v740_v18 }
 0x2fc   :  { %v2476_v19 = vpop.eup %2153 }
 0x2fd   :  { %v759_v20 = vsel %vm231_vm2, %v2476_v19, 0.0 }
 0x2fe   :  { %760 = vadd.xlane.f32.xlu1 %v759_v20 }
 0x2ff   :  { %v2480_v21 = vpop.eup %2155 }
 0x300   :  { %v756_v22 = vsel %vm231_vm2, %v2480_v21, 0.0 }
 0x301   :  { %757 = vadd.xlane.f32.xlu0 %v756_v22 }
 0x30f   :  { %1044 = vrot.lane.b32.xlu1 %v2391_v62, %s2230_s30 }
 0x35d   :  { %v370_v23 = vpop.f32.mrb[4].mxu1  ;;  %v419_v24 = vpop.f32.mrb[8].mxu0 }
 0x35e   :  { %v623_v25 = vmul.f32 0.35355338, %v370_v23  ;;  %v624_v26 = vmul.f32 0.35355338, %v419_v24  ;;  %v1969_v27 = vpop.f32.mrb[5].mxu1  ;;  %v1975_v28 = vpop.f32.mrb[9].mxu0 }
 0x35f   :  { %v373_v29 = vpop.f32.mrb[6].mxu1  ;;  %v422_v30 = vpop.f32.mrb[10].mxu0 }
 0x360   :  { %v734_v31 = vadd.f32 %v703_v52, %v623_v25  ;;  %v735_v32 = vadd.f32 %v707_v57, %v624_v26  ;;  %v1970_v33 = vpop.f32.mrb[7].mxu1  ;;  %v1976_v34 = vpop.f32.mrb[11].mxu0 }
 0x362   :  { %v744_v35 = vmul.f32 1.442695, %v734_v31  ;;  %v746_v36 = vmul.f32 1.442695, %v735_v32 }
 0x364   :  { %2157 = vpow2.f32 %v744_v35 }
 0x365   :  { %v468_v39 = vpop.f32.mrb[8].mxu1  ;;  %v517_v40 = vpop.f32.mrb[12].mxu0  ;;  %2159 = vpow2.f32 %v746_v36 }
 0x366   :  { %v625_v41 = vmul.f32 0.35355338, %v468_v39  ;;  %v626_v62 = vmul.f32 0.35355338, %v517_v40  ;;  %v1981_v42 = vpop.f32.mrb[9].mxu1  ;;  %v1987_v43 = vpop.f32.mrb[13].mxu0 }
 0x367   :  { %v471_v44 = vpop.f32.mrb[10].mxu1  ;;  %v520_v45 = vpop.f32.mrb[14].mxu0 }
 0x368   :  { %v736_v46 = vadd.f32 %v711_v54, %v625_v41  ;;  %v737_v47 = vadd.f32 %v715_v58, %v626_v62  ;;  %v1982_v48 = vpop.f32.mrb[11].mxu1  ;;  %v1988_v49 = vpop.f32.mrb[15].mxu0 }
 0x36a   :  { %v750_v50 = vmul.f32 1.442695, %v737_v47  ;;  %v748_v18 = vmul.f32 1.442695, %v736_v46 }
 0x36c   :  { %2161 = vpow2.f32 %v750_v50 }
 0x36d   :  { %v566_v51 = vpop.f32.mrb[12].mxu1  ;;  %v615_v52 = vpop.f32.mrb[16].mxu0 }
 0x36e   :  { %v2486_v53 = vpop.eup %2157  ;;  %v627_v55 = vmul.f32 0.35355338, %v566_v51  ;;  %v628_v56 = vmul.f32 0.35355338, %v615_v52  ;;  %v1993_v57 = vpop.f32.mrb[13].mxu1 }
 0x36f   :  { %v1999_v59 = vpop.f32.mrb[17].mxu0  ;;  %v569_v0 = vpop.f32.mrb[14].mxu1  ;;  %v762_v2 = vsel %vm231_vm2, %v2486_v53, 0.0 }
 0x370   :  { %v618_v1 = vpop.f32.mrb[18].mxu0  ;;  %v2490_v3 = vpop.eup %2159  ;;  %v738_v54 = vadd.f32 %v2469_v60, %v627_v55  ;;  %v739_v58 = vadd.f32 %v2472_v61, %v628_v56  ;;  %763 = vadd.xlane.f32.xlu0 %v762_v2  ;;  %v1192_v2 = vld [vmem:[%s2698_s7] sm:$0xf] }
 0x371   :  { %v1994_v6 = vpop.f32.mrb[15].mxu1  ;;  %v2000_v7 = vpop.f32.mrb[19].mxu0  ;;  %v765_v10 = vsel %vm231_vm2, %v2490_v3, 0.0 }
 0x372   :  { %v754_v8 = vmul.f32 1.442695, %v739_v58  ;;  %v901_v61 = vpop.permute.xlu1 %900  ;;  %v752_v26 = vmul.f32 1.442695, %v738_v54  ;;  %v1200_v54 = vsel %vm638_vm3, %v1192_v2, 0 }
 0x373   :  { %v1193_v58 = vld [vmem:[%s2698_s7 + $0x4] sm:$0xf] }
 0x374   :  { %766 = vadd.xlane.f32.xlu0 %v765_v10  ;;  %2163 = vpow2.f32 %v754_v8  ;;  %v1247_v6 = vsel %vm638_vm3, %v1193_v58, 0 }
 0x376   :  { %v2496_v11 = vpop.eup %2161  ;;  %v949_v14 = vpop.permute.xlu1 %948 }
 0x377   :  { %v771_v12 = vsel %vm231_vm2, %v2496_v11, 0.0  ;;  %v954_v25 = vsel %vm638_vm3, %v949_v14, 0 }
 0x378   :  { %772 = vadd.xlane.f32.xlu1 %v771_v12 }
 0x37e   :  { %v2500_v13 = vpop.eup %2163 }
 0x37f   :  { %v777_v60 = vsel %vm231_vm2, %v2500_v13, 0.0 }
 0x380   :  { %778 = vadd.xlane.f32.xlu1 %v777_v60 }
 0x38a   :  { %996 = vrot.lane.b32.xlu0 %v2393_v63, %s2230_s30 }
 0x38b   :  { %v761_v15 = vpop.xlane.xlu1 %760 }
 0x38c   :  { %2165 = vrcp.f32 %v761_v15  ;;  %v1194_v15 = vld [vmem:[%s2698_s7 + $0x8] sm:$0xf] }
 0x38e   :  { %v758_v16 = vpop.xlane.xlu0 %757 }
 0x38f   :  { %2167 = vrcp.f32 %v758_v16  ;;  %v1045_v31 = vpop.permute.xlu1 %1044  ;;  %v1294_v16 = vsel %vm638_vm3, %v1194_v15, 0 }
 0x390   :  { %2169 = vpow2.f32 %v748_v18  ;;  %v1050_v43 = vsel %vm638_vm3, %v1045_v31, 0 }
 0x391   :  { %1140 = vrot.lane.b32.xlu1 %v2401_v4, %s2230_s30  ;;  %v906_v4 = vsel %vm638_vm3, %v901_v61, 0  ;;  %2171 = vpow2.f32 %v752_v26 }
 0x396   :  { %v2166_v17 = vpop.eup %2165 }
 0x397   :  { %v789_v20 = vmul.f32 %v2166_v17, %v2476_v19 }
 0x399   :  { %v2168_v22 = vpop.eup %2167  ;;  %v797_v23 = vpack.c.bf16 %v789_v20, %v789_v20 }
 0x39a   :  { %v788_v24 = vmul.f32 %v2168_v22, %v2480_v21  ;;  %v2170_v19 = vpop.eup %2169  ;;  %v1195_v22 = vld [vmem:[%s2698_s7 + $0xc] sm:$0xf] }
 0x39b   :  { %2010 = vmatmul.mubr.msk.bf16.vlgmr.msra.gmra.mrb[20].mxu0 %vm231_vm2, %v797_v23  ;;  %v768_v21 = vsel %vm231_vm2, %v2170_v19, 0.0  ;;  %v2172_v27 = vpop.eup %2171 }
 0x39c   :  { %2020 = vmatpush3.bf16.msra.mxu0 %v954_v25  ;;  %v796_v63 = vpack.c.bf16 %v788_v24, %v788_v24  ;;  %2021 = vmatprep.mubr.msk.bf16.mxu0 %vm2224_vm1, %v2223_v9  ;;  %v774_v28 = vsel %vm231_vm2, %v2172_v27, 0.0 }
 0x39d   :  { %2031 = vmatprep.subr.bf16.mxu0 %v2223_v9 }
 0x39e   :  { %2004 = vmatmul.mubr.msk.bf16.vlgmr.msra.gmra.mrb[16].mxu1 %vm231_vm2, %v796_v63  ;;  %v1341_v63 = vsel %vm638_vm3, %v1195_v22, 0 }
 0x39f   :  { %2014 = vmatpush3.bf16.msra.mxu1 %v906_v4  ;;  %2015 = vmatprep.mubr.msk.bf16.mxu1 %vm2224_vm1, %v2223_v9 }
 0x3a0   :  { %2025 = vmatprep.subr.bf16.mxu1 %v2223_v9 }
 0x3a9   :  { %769 = vadd.xlane.f32.xlu0 %v768_v21 }
 0x3ad   :  { %775 = vadd.xlane.f32.xlu0 %v774_v28 }
 0x3c3   :  { %1092 = vrot.lane.b32.xlu0 %v2403_v5, %s2230_s30 }
 0x3fd   :  { %v764_v29 = vpop.xlane.xlu0 %763 }
 0x3fe   :  { %2173 = vrcp.f32 %v764_v29 }
 0x401   :  { %v767_v30 = vpop.xlane.xlu0 %766 }
 0x402   :  { %2175 = vrcp.f32 %v767_v30 }
 0x405   :  { %v773_v32 = vpop.xlane.xlu1 %772  ;;  %v997_v35 = vpop.permute.xlu0 %996 }
 0x406   :  { %2177 = vrcp.f32 %v773_v32  ;;  %v1002_v41 = vsel %vm638_vm3, %v997_v35, 0 }
 0x408   :  { %v2174_v33 = vpop.eup %2173 }
 0x409   :  { %v790_v34 = vmul.f32 %v2174_v33, %v2486_v53 }
 0x40b   :  { %v798_v36 = vpack.c.bf16 %v790_v34, %v790_v34 }
 0x40c   :  { %v2176_v39 = vpop.eup %2175 }
 0x40d   :  { %v791_v40 = vmul.f32 %v2176_v39, %v2490_v3  ;;  %2016 = vmatmul.mubr.msk.bf16.vlgmr.msra.gmra.mrb[20].mxu1 %vm231_vm2, %v798_v36  ;;  %v779_v5 = vpop.xlane.xlu1 %778 }
 0x40e   :  { %2026 = vmatpush3.bf16.msra.mxu1 %v1002_v41  ;;  %2027 = vmatprep.mubr.msk.bf16.mxu1 %vm2224_vm1, %v2223_v9  ;;  %2179 = vrcp.f32 %v779_v5 }
 0x40f   :  { %v799_v62 = vpack.c.bf16 %v791_v40, %v791_v40  ;;  %2037 = vmatprep.subr.bf16.mxu1 %v2223_v9 }
 0x410   :  { %v2178_v42 = vpop.eup %2177 }
 0x411   :  { %2022 = vmatmul.mubr.msk.bf16.vlgmr.msra.gmra.mrb[24].mxu0 %vm231_vm2, %v799_v62  ;;  %v793_v44 = vmul.f32 %v2178_v42, %v2496_v11  ;;  %v1141_v45 = vpop.permute.xlu1 %1140 }
 0x412   :  { %2032 = vmatpush3.bf16.msra.mxu0 %v1050_v43  ;;  %2033 = vmatprep.mubr.msk.bf16.mxu0 %vm2224_vm1, %v2223_v9  ;;  %v1146_v48 = vsel %vm638_vm3, %v1141_v45, 0 }
 0x413   :  { %2043 = vmatprep.subr.bf16.mxu0 %v2223_v9  ;;  %v801_v46 = vpack.c.bf16 %v793_v44, %v793_v44 }
 0x418   :  { %v2180_v47 = vpop.eup %2179 }
 0x419   :  { %2034 = vmatmul.mubr.msk.bf16.vlgmr.msra.gmra.mrb[28].mxu0 %vm231_vm2, %v801_v46  ;;  %v795_v49 = vmul.f32 %v2180_v47, %v2500_v13 }
 0x41a   :  { %2044 = vmatpush3.bf16.msra.mxu0 %v1146_v48  ;;  %2045 = vmatprep.mubr.msk.bf16.mxu0 %vm2224_vm1, %v2223_v9 }
 0x41b   :  { %2055 = vmatprep.subr.bf16.mxu0 %v2223_v9  ;;  %v803_v50 = vpack.c.bf16 %v795_v49, %v795_v49 }
 0x421   :  { %2046 = vmatmul.mubr.msk.bf16.vlgmr.msra.gmra.mrb[32].mxu0 %vm231_vm2, %v803_v50 }
 0x422   :  { %2057 = vmatprep.mubr.msk.bf16.mxu0 %vm2224_vm1, %v2223_v9  ;;  %2056 = vmatpush3.bf16.msra.mxu0 %v1247_v6 }
 0x423   :  { %2067 = vmatprep.subr.bf16.mxu0 %v2223_v9 }
 0x436   :  { %v770_v51 = vpop.xlane.xlu0 %769 }
 0x437   :  { %2181 = vrcp.f32 %v770_v51 }
 0x43a   :  { %v776_v52 = vpop.xlane.xlu0 %775 }
 0x43b   :  { %2183 = vrcp.f32 %v776_v52 }
 0x43e   :  { %v1093_v56 = vpop.permute.xlu0 %1092 }
 0x43f   :  { %v1098_v0 = vsel %vm638_vm3, %v1093_v56, 0 }
 0x441   :  { %v2182_v53 = vpop.eup %2181 }
 0x442   :  { %v792_v55 = vmul.f32 %v2182_v53, %v2170_v19 }
 0x444   :  { %v800_v57 = vpack.c.bf16 %v792_v55, %v792_v55 }
 0x445   :  { %v2184_v59 = vpop.eup %2183 }
 0x446   :  { %2028 = vmatmul.mubr.msk.bf16.vlgmr.msra.gmra.mrb[24].mxu1 %vm231_vm2, %v800_v57  ;;  %v794_v1 = vmul.f32 %v2184_v59, %v2172_v27 }
 0x447   :  { %2038 = vmatpush3.bf16.msra.mxu1 %v1098_v0  ;;  %2039 = vmatprep.mubr.msk.bf16.mxu1 %vm2224_vm1, %v2223_v9 }
 0x448   :  { %2049 = vmatprep.subr.bf16.mxu1 %v2223_v9  ;;  %v802_v3 = vpack.c.bf16 %v794_v1, %v794_v1 }
 0x44e   :  { %2040 = vmatmul.mubr.msk.bf16.vlgmr.msra.gmra.mrb[28].mxu1 %vm231_vm2, %v802_v3 }
 0x44f   :  { %2050 = vmatpush3.bf16.msra.mxu1 %v1200_v54  ;;  %2051 = vmatprep.mubr.msk.bf16.mxu1 %vm2224_vm1, %v2223_v9 }
 0x450   :  { %2061 = vmatprep.subr.bf16.mxu1 %v2223_v9 }
 0x46e   :  { %v894_v7 = vpop.f32.mrb[20].mxu0 }
 0x46f   :  { %v2011_v8 = vpop.f32.mrb[21].mxu0 }
 0x470   :  { %v897_v10 = vpop.f32.mrb[22].mxu0 }
 0x471   :  { %v2012_v11 = vpop.f32.mrb[23].mxu0  ;;  %v846_v12 = vpop.f32.mrb[16].mxu1 }
 0x472   :  { %v1188_v13 = vpack.c.bf16 %v894_v7, %v846_v12  ;;  %v2005_v60 = vpop.f32.mrb[17].mxu1  ;;  %v1865_v11 = vld [vmem:[%s2699_s8] ss:$0 sm:$0xff] }
 0x473   :  { %v849_v61 = vpop.f32.mrb[18].mxu1 }
 0x474   :  { %v2006_v14 = vpop.f32.mrb[19].mxu1  ;;  %2052 = vmatmul.mubr.msk.bf16.vlgmr.msra.gmra.mrb[32].mxu1 %vm231_vm2, %v1188_v13 }
 0x475   :  { %2063 = vmatprep.mubr.msk.bf16.mxu1 %vm2224_vm1, %v2223_v9  ;;  %2062 = vmatpush3.bf16.msra.mxu1 %v1294_v16 }
 0x476   :  { %2073 = vmatprep.subr.bf16.mxu1 %v2223_v9 }
 0x4e0   :  { %v942_v17 = vpop.f32.mrb[20].mxu1 }
 0x4e1   :  { %v2017_v18 = vpop.f32.mrb[21].mxu1 }
 0x4e2   :  { %v945_v20 = vpop.f32.mrb[22].mxu1 }
 0x4e3   :  { %v2018_v23 = vpop.f32.mrb[23].mxu1 }
 0x4e4   :  { %v990_v24 = vpop.f32.mrb[24].mxu0 }
 0x4e5   :  { %v1189_v25 = vpack.c.bf16 %v990_v24, %v942_v17  ;;  %v2023_v26 = vpop.f32.mrb[25].mxu0 }
 0x4e6   :  { %v993_v4 = vpop.f32.mrb[26].mxu0 }
 0x4e7   :  { %v2024_v19 = vpop.f32.mrb[27].mxu0  ;;  %2058 = vmatmul.mubr.msk.bf16.vlgmr.msra.gmra.mrb[36].mxu0 %vm231_vm2, %v1189_v25 }
 0x4e8   :  { %2068 = vmatpush3.bf16.msra.mxu0 %v1341_v63  ;;  %2069 = vmatprep.mubr.msk.bf16.mxu0 %vm2224_vm1, %v2223_v9 }
 0x4e9   :  { %2081 = vmatprep.subr.bf16.mxu0 %v2223_v9 }
 0x4ec   :  { %v1086_v21 = vpop.f32.mrb[28].mxu0 }
 0x4ed   :  { %v2035_v27 = vpop.f32.mrb[29].mxu0 }
 0x4ee   :  { %v1089_v28 = vpop.f32.mrb[30].mxu0 }
 0x4ef   :  { %v2036_v29 = vpop.f32.mrb[31].mxu0 }
 0x4f4   :  { %v1182_v30 = vpop.f32.mrb[32].mxu0 }
 0x4f5   :  { %v2047_v31 = vpop.f32.mrb[33].mxu0 }
 0x4f6   :  { %v1185_v32 = vpop.f32.mrb[34].mxu0 }
 0x4f7   :  { %v2048_v33 = vpop.f32.mrb[35].mxu0 }
 0x519   :  { %v1038_v34 = vpop.f32.mrb[24].mxu1 }
 0x51a   :  { %v1190_v35 = vpack.c.bf16 %v1086_v21, %v1038_v34  ;;  %v2029_v36 = vpop.f32.mrb[25].mxu1 }
 0x51b   :  { %v1041_v39 = vpop.f32.mrb[26].mxu1 }
 0x51c   :  { %v2030_v40 = vpop.f32.mrb[27].mxu1  ;;  %2064 = vmatmul.mubr.msk.bf16.vlgmr.msra.gmra.mrb[36].mxu1 %vm231_vm2, %v1190_v35 }
 0x51d   :  { %2077 = vmatprep.mubr.msk.bf16.mxu1 %vm2224_vm1, %v2223_v9 }
 0x521   :  { %v1134_v41 = vpop.f32.mrb[28].mxu1 }
 0x522   :  { %v1191_v5 = vpack.c.bf16 %v1182_v30, %v1134_v41  ;;  %v2041_v62 = vpop.f32.mrb[29].mxu1 }
 0x523   :  { %v1137_v42 = vpop.f32.mrb[30].mxu1 }
 0x524   :  { %v2042_v43 = vpop.f32.mrb[31].mxu1  ;;  %2070 = vmatmul.mubr.msk.bf16.vlgmr.msra.gmra.mrb[40].mxu0 %vm231_vm2, %v1191_v5 }
 0x525   :  { %2089 = vmatprep.mubr.msk.bf16.mxu0 %vm2224_vm1, %v2223_v9  ;;  %v1866_v43 = vld [vmem:[%s2700_s9] ss:$0 sm:$0xff] }
 0x547   :  { %v1236_v44 = vpop.f32.mrb[32].mxu1 }
 0x548   :  { %v2053_v45 = vpop.f32.mrb[33].mxu1  ;;  %v1384_v49 = vsel %vm82_vm0, %v1236_v44, 0.0 }
 0x549   :  { %v1239_v46 = vpop.f32.mrb[34].mxu1 }
 0x54a   :  { %v2054_v47 = vpop.f32.mrb[35].mxu1  ;;  %v1391_v55 = vsel %vm82_vm0, %v1239_v46, 0.0 }
 0x5ba   :  { %v1283_v48 = vpop.f32.mrb[36].mxu0 }
 0x5bb   :  { %v1385_v50 = vsel %vm82_vm0, %v1283_v48, 0.0  ;;  %v2059_v51 = vpop.f32.mrb[37].mxu0  ;;  %v1867_v48 = vld [vmem:[%s2701_s10] ss:$0 sm:$0xff] }
 0x5bc   :  { %v1386_v52 = vadd.f32 %v1385_v50, %v1384_v49  ;;  %v1286_v53 = vpop.f32.mrb[38].mxu0 }
 0x5bd   :  { %v1392_v56 = vsel %vm82_vm0, %v1286_v53, 0.0  ;;  %v2060_v57 = vpop.f32.mrb[39].mxu0  ;;  %v2141_v53 = vld [vmem:[%s2704_s13] sm:$0xff]  }
 0x5be   :  { %v1393_v59 = vadd.f32 %v1392_v56, %v1391_v55  ;;  %2082 = vmatpush3.bf16.msra.mxu0 %v2141_v53  ;;  %v2142_v55 = vld [vmem:[%s2704_s13 + $0x8] sm:$0xff]   ;;  %v2143_v56 = vld [vmem:[%s2704_s13 + $0x10] sm:$0xff]   ;;  %v2144_v57 = vld [vmem:[%s2704_s13 + $0x18] sm:$0xff]  }
 0x5bf   :  { %2083 = vmatprep.subr.bf16.mxu0 %v2223_v9 }
 0x5c2   :  { %2084 = vmatpush3.bf16.msra.mxu0 %v2142_v55 }
 0x5c3   :  { %2085 = vmatprep.subr.bf16.mxu0 %v2223_v9 }
 0x5c6   :  { %2086 = vmatpush3.bf16.msra.mxu0 %v2143_v56 }
 0x5c7   :  { %2087 = vmatprep.subr.bf16.mxu0 %v2223_v9 }
 0x5ca   :  { %2088 = vmatpush3.bf16.msra.mxu0 %v2144_v57 }
 0x5ef   :  { %v1330_v0 = vpop.f32.mrb[36].mxu1 }
 0x5f0   :  { %v1387_v1 = vsel %vm82_vm0, %v1330_v0, 0.0  ;;  %v2065_v2 = vpop.f32.mrb[37].mxu1 }
 0x5f1   :  { %v1388_v3 = vadd.f32 %v1387_v1, %v1386_v52  ;;  %v1333_v54 = vpop.f32.mrb[38].mxu1 }
 0x5f2   :  { %v1394_v58 = vsel %vm82_vm0, %v1333_v54, 0.0  ;;  %v2066_v6 = vpop.f32.mrb[39].mxu1 }
 0x5f3   :  { %v1395_v7 = vadd.f32 %v1394_v58, %v1393_v59  ;;  %v1868_v59 = vld [vmem:[%s2703_s12] ss:$0 sm:$0xff] }
 0x5f7   :  { %v1377_v8 = vpop.f32.mrb[40].mxu0 }
 0x5f8   :  { %v1389_v10 = vsel %vm82_vm0, %v1377_v8, 0.0  ;;  %v2071_v12 = vpop.f32.mrb[41].mxu0 }
 0x5f9   :  { %v1390_v13 = vadd.f32 %v1389_v10, %v1388_v3  ;;  %v1380_v60 = vpop.f32.mrb[42].mxu0 }
 0x5fa   :  { %v1396_v61 = vsel %vm82_vm0, %v1380_v60, 0.0  ;;  %v2072_v14 = vpop.f32.mrb[43].mxu0 }
 0x5fb   :  { %v1405_v15 = vadd.f32 %v1865_v11, %v1390_v13  ;;  %v1397_v16 = vadd.f32 %v1396_v61, %v1395_v7 }
 0x5fd   :  { %v1406_v17 = vadd.f32 %v1865_v11, %v1397_v16  ;;  %v1407_v18 = vadd.f32 %v1405_v15, %v2374_v37  ;;  %v2139_v37 = vld [vmem:[%s2702_s11] sm:$0xff]  }
 0x5fe   :  { %2074 = vmatpush3.bf16.msra.mxu1 %v2139_v37 }
 0x5ff   :  { %v1411_v20 = vsel %vm82_vm0, %v1407_v18, 0.0  ;;  %v1408_v22 = vadd.f32 %v1406_v17, %v2376_v38  ;;  %v1419_v23 = vmul.f32 %v1407_v18, %v1407_v18  ;;  %v2140_v38 = vld [vmem:[%s2702_s11 + $0x8] sm:$0xff]   ;;  %2075 = vmatprep.subr.bf16.mxu1 %v2223_v9 }
 0x600   :  { %1412 = vadd.xlane.f32.xlu0 %v1411_v20 }
 0x601   :  { %v1414_v24 = vsel %vm82_vm0, %v1408_v22, 0.0  ;;  %v1421_v25 = vsel %vm82_vm0, %v1419_v23, 0.0  ;;  %v1420_v26 = vmul.f32 %v1408_v22, %v1408_v22 }
 0x602   :  { %1415 = vadd.xlane.f32.xlu1 %v1414_v24  ;;  %2076 = vmatpush3.bf16.msra.mxu1 %v2140_v38 }
 0x603   :  { %v1424_v63 = vsel %vm82_vm0, %v1420_v26, 0.0  ;;  %2093 = vmatprep.subr.bf16.mxu1 %v2223_v9  ;;  %v1872_v26 = vld [vmem:[%s2705_s14] ss:$0 sm:$0xff] }
 0x604   :  { %1422 = vadd.xlane.f32.xlu0 %v1421_v25 }
 0x608   :  { %1425 = vadd.xlane.f32.xlu0 %v1424_v63 }
 0x68d   :  { %v1413_v4 = vpop.xlane.xlu0 %1412 }
 0x68e   :  { %v1417_v19 = vmul.f32 0.03125, %v1413_v4 }
 0x68f   :  { %v1416_v21 = vpop.xlane.xlu1 %1415 }
 0x690   :  { %v1429_v28 = vmul.f32 %v1417_v19, %v1417_v19  ;;  %v1418_v29 = vmul.f32 0.03125, %v1416_v21  ;;  %v1435_v5 = vsub.f32 %v1407_v18, %v1417_v19 }
 0x691   :  { %v1423_v27 = vpop.xlane.xlu0 %1422 }
 0x692   :  { %v1427_v30 = vmul.f32 0.03125, %v1423_v27  ;;  %v1430_v33 = vmul.f32 %v1418_v29, %v1418_v29  ;;  %v1436_v44 = vsub.f32 %v1408_v22, %v1418_v29 }
 0x694   :  { %v1431_v31 = vsub.f32 %v1427_v30, %v1429_v28 }
 0x695   :  { %v1426_v32 = vpop.xlane.xlu0 %1425 }
 0x696   :  { %v1433_v34 = vmax.f32 %v1431_v31, 0.0  ;;  %v1428_v35 = vmul.f32 0.03125, %v1426_v32 }
 0x698   :  { %v1437_v36 = vadd.f32 1e-12, %v1433_v34  ;;  %v1432_v39 = vsub.f32 %v1428_v35, %v1430_v33  ;;  %v2145_v35 = vld [vmem:[%s2708_s17] sm:$0xff]  }
 0x69a   :  { %2185 = vrsqrt.f32 %v1437_v36  ;;  %v1434_v40 = vmax.f32 %v1432_v39, 0.0  ;;  %v2146_v36 = vld [vmem:[%s2708_s17 + $0x8] sm:$0xff]  }
 0x69c   :  { %v1438_v41 = vadd.f32 1e-12, %v1434_v40 }
 0x69e   :  { %2187 = vrsqrt.f32 %v1438_v41 }
 0x6a4   :  { %v2186_v62 = vpop.eup %2185 }
 0x6a5   :  { %v1441_v42 = vmul.f32 %v2186_v62, %v1435_v5 }
 0x6a7   :  { %v1449_v47 = vmul.f32 %v1866_v43, %v1441_v42 }
 0x6a8   :  { %v2188_v45 = vpop.eup %2187 }
 0x6a9   :  { %v1442_v46 = vmul.f32 %v2188_v45, %v1436_v44  ;;  %v1457_v50 = vadd.f32 %v1867_v48, %v1449_v47 }
 0x6ab   :  { %v1450_v49 = vmul.f32 %v1866_v43, %v1442_v46 }
 0x6ad   :  { %v1458_v51 = vadd.f32 %v1867_v48, %v1450_v49 }
 0x6af   :  { %v1459_v52 = vpack.c.bf16 %v1458_v51, %v1457_v50 }
 0x6b1   :  { %2078 = vmatmul.mubr.msk.bf16.vlgmr.msra.gmra.mrb[40].mxu1 %vm82_vm0, %v1459_v52 }
 0x6b2   :  { %2097 = vmatprep.mubr.msk.bf16.mxu1 %vm2224_vm1, %v2223_v9  ;;  %2094 = vmatpush3.bf16.msra.mxu1 %v2145_v35 }
 0x6b3   :  { %2095 = vmatprep.subr.bf16.mxu1 %v2223_v9 }
 0x6b6   :  { %2096 = vmatpush3.bf16.msra.mxu1 %v2146_v36 }
 0x6b7   :  { %2101 = vmatprep.subr.bf16.mxu1 %v2223_v9 }
 0x784   :  { %v1520_v0 = vpop.f32.mrb[40].mxu1 }
 0x785   :  { %v1521_v1 = vadd.f32 %v1868_v59, %v1520_v0  ;;  %v2079_v2 = vpop.f32.mrb[41].mxu1  ;;  %v1878_v0 = vld [vmem:[%s2706_s15] ss:$0 sm:$0xff] }
 0x786   :  { %v1523_v3 = vpop.f32.mrb[42].mxu1 }
 0x787   :  { %v1527_v54 = vmul.f32 %v1521_v1, %v1521_v1  ;;  %v1524_v58 = vadd.f32 %v1868_v59, %v1523_v3  ;;  %v2080_v6 = vpop.f32.mrb[43].mxu1 }
 0x789   :  { %v1529_v7 = vmul.f32 %v1527_v54, %v1521_v1  ;;  %v1528_v8 = vmul.f32 %v1524_v58, %v1524_v58  ;;  %v1879_v54 = vld [vmem:[%s2707_s16] ss:$0 sm:$0xff] }
 0x78b   :  { %v1531_v10 = vmul.f32 0.044715, %v1529_v7  ;;  %v1530_v11 = vmul.f32 %v1528_v8, %v1524_v58 }
 0x78d   :  { %v1533_v12 = vadd.f32 %v1531_v10, %v1521_v1  ;;  %v1532_v13 = vmul.f32 0.044715, %v1530_v11  ;;  %v2147_v11 = vld [vmem:[%s2710_s19] sm:$0xff]  }
 0x78f   :  { %v1535_v60 = vmul.f32 0.7978846, %v1533_v12  ;;  %v1534_v61 = vadd.f32 %v1532_v13, %v1524_v58  ;;  %v2148_v12 = vld [vmem:[%s2710_s19 + $0x8] sm:$0xff]   ;;  %v1880_v13 = vld [vmem:[%s2709_s18] ss:$0 sm:$0xff]  ;;  %s2233_s18 = smov [#allocation2]  }
 0x790   :  { %s1831_s22 = sshll.u32 %s2233_s18, 4  ;;  %s1832_s22 = int_to_ptr.vmem [resolvable:$true] %s1831_s22 }
 0x791   :  { %2189 = vtanh.f32 %v1535_v60  ;;  %v1536_v14 = vmul.f32 0.7978846, %v1534_v61  ;;  %s2199_s10 = scalar_lea.vmem %s1832_s22, 32  ;;  %p2204_p1 = scmp.lt.s32.totalorder %s1832_s22, %s1832_s22 }
 0x792   :  { %p2200_p0 = scmp.ne.s32.totalorder %s1832_s22, %s2199_s10  ;;  %p2205_p2 = scmp.lt.s32.totalorder %s2199_s10, %s2199_s10 }
 0x793   :  { %2191 = vtanh.f32 %v1536_v14 }
 0x794   :  { %p2206_p3 = por %p2205_p2, %p2204_p1 }
 0x796   :  { %p2207_p4 = pnand %p2206_p3, %p2200_p0 }
 0x79b   :  { %v2190_v15 = vpop.eup %2189 }
 0x79c   :  { %v1539_v16 = vadd.f32 1.0, %v2190_v15 }
 0x79d   :  { %v2192_v17 = vpop.eup %2191 }
 0x79e   :  { %v1541_v18 = vmul.f32 0.5, %v1539_v16  ;;  %v1540_v20 = vadd.f32 1.0, %v2192_v17  ;;  %v1755_v17 = vld [vmem:[%s2726_s5] sm:$0x3] }
 0x7a0   :  { %v1542_v22 = vmul.f32 0.5, %v1540_v20  ;;  %v1543_v23 = vmul.f32 %v1541_v18, %v1521_v1 }
 0x7a2   :  { %v1544_v24 = vmul.f32 %v1542_v22, %v1524_v58  ;;  %v1884_v22 = vld [vmem:[%s2711_s20] ss:$0 sm:$0xff] }
 0x7a4   :  { %v1545_v25 = vpack.c.bf16 %v1544_v24, %v1543_v23 }
 0x7a6   :  { %2090 = vmatmul.mubr.msk.bf16.vlgmr.msra.gmra.mrb[44].mxu0 %vm1585_vm7, %v1545_v25 }
 0x879   :  { %v1623_v63 = vpop.f32.mrb[44].mxu0 }
 0x87a   :  { %v1624_v37 = vadd.f32 %v1872_v26, %v1623_v63  ;;  %v2091_v38 = vpop.f32.mrb[45].mxu0 }
 0x87b   :  { %v1626_v4 = vpop.f32.mrb[46].mxu0 }
 0x87c   :  { %v1630_v19 = vadd.f32 %v1624_v37, %v1457_v50  ;;  %v1627_v21 = vadd.f32 %v1872_v26, %v1626_v4  ;;  %v2092_v27 = vpop.f32.mrb[47].mxu0 }
 0x87e   :  { %v1631_v28 = vadd.f32 %v1627_v21, %v1458_v51  ;;  %v1634_v29 = vsel %vm82_vm0, %v1630_v19, 0.0  ;;  %v1642_v30 = vmul.f32 %v1630_v19, %v1630_v19 }
 0x87f   :  { %1635 = vadd.xlane.f32.xlu1 %v1634_v29 }
 0x880   :  { %v1637_v31 = vsel %vm82_vm0, %v1631_v28, 0.0  ;;  %v1643_v32 = vmul.f32 %v1631_v28, %v1631_v28  ;;  %v1644_v33 = vsel %vm82_vm0, %v1642_v30, 0.0 }
 0x881   :  { %1638 = vadd.xlane.f32.xlu0 %v1637_v31 }
 0x882   :  { %v1647_v34 = vsel %vm82_vm0, %v1643_v32, 0.0 }
 0x883   :  { %1645 = vadd.xlane.f32.xlu1 %v1644_v33 }
 0x885   :  { %1648 = vadd.xlane.f32.xlu0 %v1647_v34 }
 0x90c   :  { %v1636_v39 = vpop.xlane.xlu1 %1635 }
 0x90d   :  { %v1640_v40 = vmul.f32 0.03125, %v1636_v39 }
 0x90e   :  { %v1639_v41 = vpop.xlane.xlu0 %1638 }
 0x90f   :  { %v1641_v5 = vmul.f32 0.03125, %v1639_v41  ;;  %v1652_v42 = vmul.f32 %v1640_v40, %v1640_v40  ;;  %v1658_v53 = vsub.f32 %v1630_v19, %v1640_v40 }
 0x910   :  { %v1646_v62 = vpop.xlane.xlu1 %1645 }
 0x911   :  { %v1650_v43 = vmul.f32 0.03125, %v1646_v62  ;;  %v1653_v45 = vmul.f32 %v1641_v5, %v1641_v5  ;;  %v1659_v56 = vsub.f32 %v1631_v28, %v1641_v5 }
 0x912   :  { %v1649_v44 = vpop.xlane.xlu0 %1648 }
 0x913   :  { %v1654_v46 = vsub.f32 %v1650_v43, %v1652_v42  ;;  %v1651_v47 = vmul.f32 0.03125, %v1649_v44 }
 0x915   :  { %v1656_v48 = vmax.f32 %v1654_v46, 0.0  ;;  %v1655_v49 = vsub.f32 %v1651_v47, %v1653_v45 }
 0x917   :  { %v1660_v50 = vadd.f32 1e-12, %v1656_v48  ;;  %v1657_v51 = vmax.f32 %v1655_v49, 0.0 }
 0x919   :  { %2193 = vrsqrt.f32 %v1660_v50  ;;  %v1661_v52 = vadd.f32 1e-12, %v1657_v51 }
 0x91b   :  { %2195 = vrsqrt.f32 %v1661_v52 }
 0x923   :  { %v2194_v55 = vpop.eup %2193 }
 0x924   :  { %v1664_v57 = vmul.f32 %v2194_v55, %v1658_v53 }
 0x925   :  { %v2196_v59 = vpop.eup %2195 }
 0x926   :  { %v1665_v1 = vmul.f32 %v2196_v59, %v1659_v56  ;;  %v1672_v2 = vmul.f32 %v1878_v0, %v1664_v57 }
 0x928   :  { %v1673_v3 = vmul.f32 %v1878_v0, %v1665_v1  ;;  %v1680_v6 = vadd.f32 %v1879_v54, %v1672_v2 }
 0x92a   :  { %v1681_v58 = vadd.f32 %v1879_v54, %v1673_v3 }
 0x92c   :  { %v1683_v7 = vrot.slane %v1681_v58, 7 }
 0x92e   :  { %v1686_v8 = vsel %vm1685_vm8, %v1680_v6, %v1683_v7 }
 0x92f   :  { %v1687_v10 = vpack.c.bf16 %v1686_v8, %v1686_v8 }
 0x931   :  { %2098 = vmatmul.mubr.msk.bf16.vlgmr.msra.gmra.mrb[44].mxu1 %vm82_vm0, %v1687_v10 }
 0x932   :  { %2105 = vmatprep.mubr.msk.bf16.mxu1 %vm2224_vm1, %v2223_v9  ;;  %2102 = vmatpush3.bf16.msra.mxu1 %v2147_v11 }
 0x933   :  { %2103 = vmatprep.subr.bf16.mxu1 %v2223_v9 }
 0x936   :  { %2104 = vmatpush3.bf16.msra.mxu1 %v2148_v12 }
 0xa04   :  { %v1748_v60 = vpop.f32.mrb[44].mxu1 }
 0xa05   :  { %v1749_v61 = vadd.f32 %v1880_v13, %v1748_v60  ;;  %v2099_v14 = vpop.f32.mrb[45].mxu1 }
 0xa06   :  { %v1751_v15 = vpop.f32.mrb[46].mxu1 }
 0xa07   :  { %2197 = vtanh.f32 %v1749_v61  ;;  %v2100_v16 = vpop.f32.mrb[47].mxu1 }
 0xa11   :  { %v2198_v9 = vpop.eup %2197 }
 0xa12   :  { %v1756_v18 = vmul.f32 %v2198_v9, %v1755_v17 }
 0xa14   :  { %v1757_v20 = vpack.c.bf16 %v1756_v18, %v1756_v18 }
 0xa16   :  { %2106 = vmatmul.mubr.msk.bf16.vlgmr.msra.gmra.mrb[48].mxu1 %vm82_vm0, %v1757_v20 }
 0xae9   :  { %v1818_v23 = vpop.f32.mrb[48].mxu1 }
 0xaea   :  { %v1819_v24 = vadd.f32 %v1884_v22, %v1818_v23  ;;  %v2107_v25 = vpop.f32.mrb[49].mxu1 }
 0xaeb   :  { %v1821_v26 = vpop.f32.mrb[50].mxu1 }
 0xaec   :  { %1824 = vst [vmem:[#allocation2] sm:$0x3] %v1819_v24  ;;  %v2108_v63 = vpop.f32.mrb[51].mxu1 }
 0xaed   :  { %2210 = shalt.err (!%p2207_p4)
}
 0xaee   :  { %s2211_s20 = scalar_lea.hbm %s2712_s21, 32 }
 0xaef   :  { %p2212_p5 = scmp.ne.s32.totalorder %s2712_s21, %s2211_s20  ;;  %p2215_p6 = scmp.lt.u32.totalorder %s2211_s20, %s2712_s21 }
 0xaf1   :  { %p2217_p7 = pnand %p2215_p6, %p2212_p5 }
 0xaf3   :  { %2220 = shalt.err (!%p2217_p7)
}
 0xaf4   :  { %1834 = dma.vmem_to_hbm [thread:$0]  %s1832_s22, 32, %s2712_s21, [#allocation3]  }
 0xaf5   :  { %2221 = dma.done.wait [#allocation3], 32  }
 0xaf6   :  { %2222 = vsyncadd [#allocation3], 4294967264 }
 0xaf7   :  { %1838 = vsyncpa [#allocation3], 1 }

</bundles_post_ra>
